<compile_context>
chip_gen: v7x
topology: tpu7x:2x2x1
jax: 0.10.0
libtpu: 0.0.40
codegen_flags: <defaults>
</compile_context>

<pallas_src>
import functools

import jax
import jax.numpy as jnp
from jax.experimental import pallas as pl
from jax.experimental.pallas import tpu as pltpu

# ----------------------------- hyper-parameters ------------------------------
CONT_TEMP = 0.07
KL_WEIGHT = 1.0
CONT_WEIGHT = 1.0
LAYERS = ("b1", "final")
NUM_LAYERS = len(LAYERS)
LAMBDA_CONT = CONT_WEIGHT / NUM_LAYERS
CONT_DIM = 16
CONT_K = 256            # queue length (8192 in the original; shrunk for demo)
MOMENTUM = 0.999
EPS = 1e-12


def _vmem():
    return pl.BlockSpec(memory_space=pltpu.MemorySpace.VMEM)


def _smem():
    return pl.BlockSpec(memory_space=pltpu.MemorySpace.SMEM)


# --------------------------- fused forward kernel ----------------------------
# TODO(synk): the DualEncoder architecture is not part of the provided source;
# a deterministic per-layer linear projection is used as a stand-in encoder.
# TODO(synk): at production shapes (real images, batch >> 8, cont_k = 8192) add
# a batch grid axis marked "parallel" (uses v7x's 2nd TensorCore) and tile the
# in_features reduction with an f32 VMEM accumulator sized for 64 MiB VMEM.
def _fused_kernel(imk_ref, imq_ref, wq_ref, bq_ref, wm_ref, bm_ref, queue_ref,
                  mean_ref, logvar_ref,
                  wm_out_ref, bm_out_ref, dk_out_ref, sc_ref):
    n = imk_ref.shape[0]
    inv_n = 1.0 / n
    inv_t = 1.0 / CONT_TEMP

    # ---- EMA momentum update (f32 master weights), written back in place ----
    wq = wq_ref[...]
    bq = bq_ref[...]
    wm_new = wm_ref[...] * MOMENTUM + wq * (1.0 - MOMENTUM)
    bm_new = bm_ref[...] * MOMENTUM + bq * (1.0 - MOMENTUM)
    wm_out_ref[...] = wm_new
    bm_out_ref[...] = bm_new

    # ---- stacked projections: bf16 operands to the MXU, f32 accumulation ----
    feat_k = jnp.dot(imk_ref[...], wm_new.astype(jnp.bfloat16),
                     preferred_element_type=jnp.float32) + bm_new   # (N, 2C)
    feat_q = jnp.dot(imq_ref[...], wq.astype(jnp.bfloat16),
                     preferred_element_type=jnp.float32) + bq       # (N, 2C)

    total_cont = jnp.float32(0.0)
    acc1 = jnp.float32(0.0)
    acc5 = jnp.float32(0.0)
    for li in range(NUM_LAYERS):                    # unrolled at trace time
        fk = feat_k[:, li * CONT_DIM:(li + 1) * CONT_DIM]           # (N, C)
        fq = feat_q[:, li * CONT_DIM:(li + 1) * CONT_DIM]           # (N, C)

        # F.normalize(x, dim=1): x / max(||x||_2, eps)  (normalized ONCE here)
        k = fk / jnp.maximum(
            jnp.sqrt(jnp.sum(fk * fk, axis=1, keepdims=True)), EPS)
        q = fq / jnp.maximum(
            jnp.sqrt(jnp.sum(fq * fq, axis=1, keepdims=True)), EPS)

        dk_out_ref[li] = k         # normalized key features (returned/enqueued)

        # l_pos = einsum('nc,nc->n'); l_neg = einsum('nc,ck->nk') (bf16 MXU);
        # 1/temp applied once on each logit tile.
        l_pos = jnp.sum(k * q, axis=1, keepdims=True) * inv_t       # (N, 1)
        l_neg = jnp.dot(q.astype(jnp.bfloat16),
                        queue_ref[li].astype(jnp.bfloat16),
                        preferred_element_type=jnp.float32) * inv_t  # (N, K)

        # CrossEntropy with label 0 == positive logit, without the concat:
        m = jnp.maximum(l_pos, jnp.max(l_neg, axis=1, keepdims=True))
        sum_exp = jnp.exp(l_pos - m) + jnp.sum(jnp.exp(l_neg - m), axis=1,
                                               keepdims=True)
        lse = m + jnp.log(sum_exp)
        total_cont = total_cont + jnp.sum(lse - l_pos) * (inv_n * LAMBDA_CONT)

        # top-1 / top-5 accuracy of the positive (index 0) logit
        rank = jnp.sum((l_neg > l_pos).astype(jnp.float32), axis=1,
                       keepdims=True)
        acc1 = jnp.sum((rank < 1.0).astype(jnp.float32)) * (inv_n * 100.0)
        acc5 = jnp.sum((rank < 5.0).astype(jnp.float32)) * (inv_n * 100.0)

    # ---- KL(posterior || N(0, I)) of a diagonal Gaussian, per-batch mean ----
    mu = mean_ref[...]
    lv = logvar_ref[...]
    kl_loss = 0.5 * jnp.sum(mu * mu + jnp.exp(lv) - 1.0 - lv) * inv_n

    loss = kl_loss + total_cont

    # all scalars packed into one SMEM output
    sc_ref[0] = loss
    sc_ref[1] = acc1           # last layer's accuracies, as in the reference
    sc_ref[2] = acc5
    sc_ref[3] = kl_loss
    sc_ref[4] = total_cont
    sc_ref[5] = jnp.float32(0.0)
    sc_ref[6] = jnp.float32(0.0)
    sc_ref[7] = jnp.float32(0.0)


@functools.partial(jax.jit, donate_argnums=(4, 5))
def _fused_forward(inputs, reconstructions, w_q, b_q, w_m, b_m, queue,
                   post_mean, post_logvar):
    n = inputs.shape[0]
    imk = inputs.reshape(n, -1).astype(jnp.bfloat16)            # key branch
    imq = reconstructions.reshape(n, -1).astype(jnp.bfloat16)   # query branch
    mean2 = post_mean.reshape(n, -1).astype(jnp.float32)
    logvar2 = post_logvar.reshape(n, -1).astype(jnp.float32)
    in_feat = imk.shape[1]

    wm_new, bm_new, d_k_all, scalars = pl.pallas_call(
        _fused_kernel,
        out_shape=(
            jax.ShapeDtypeStruct((in_feat, NUM_LAYERS * CONT_DIM), jnp.float32),
            jax.ShapeDtypeStruct((1, NUM_LAYERS * CONT_DIM), jnp.float32),
            jax.ShapeDtypeStruct((NUM_LAYERS, n, CONT_DIM), jnp.float32),
            jax.ShapeDtypeStruct((8,), jnp.float32),
        ),
        in_specs=[_vmem()] * 9,
        out_specs=(_vmem(), _vmem(), _vmem(), _smem()),
        input_output_aliases={4: 0, 5: 1},   # momentum params updated in place
    )(imk, imq, w_q, b_q, w_m, b_m, queue, mean2, logvar2)

    d_k = tuple(d_k_all[i] for i in range(NUM_LAYERS))
    return wm_new, bm_new, d_k, scalars[0], scalars[1], scalars[2]


# ------------------------------ module wrapper -------------------------------
class ContrastiveLossKL:
    """loss_type == 'contrastive' branch of the PyTorch Contrastive_Loss_KL."""

    def __init__(self, key, in_features, kl_weight=KL_WEIGHT,
                 cont_dim=CONT_DIM, cont_k=CONT_K):
        self.kl_weight = kl_weight
        self.layers = LAYERS
        self.cont_k = cont_k
        keys = jax.random.split(key, NUM_LAYERS + 1)

        # Stand-in DualEncoder: one linear projection per contrastive layer,
        # stacked along the output dim so both layers share one MXU matmul.
        ws = [0.02 * jax.random.normal(keys[i], (in_features, cont_dim),
                                       jnp.float32) for i in range(NUM_LAYERS)]
        self.w_q = jnp.concatenate(ws, axis=1)                   # (F, 2C)
        self.b_q = jnp.zeros((1, NUM_LAYERS * cont_dim), jnp.float32)
        # momentum encoder starts as an exact copy (distinct buffers so the
        # momentum params can be donated / updated in place)
        self.w_m = jnp.copy(self.w_q)
        self.b_m = jnp.copy(self.b_q)

        qraw = jax.random.normal(keys[-1], (NUM_LAYERS, cont_dim, cont_k),
                                 jnp.float32)
        self.queue = qraw / jnp.maximum(
            jnp.sqrt(jnp.sum(qraw * qraw, axis=1, keepdims=True)), EPS)
        self.queue_ptr = {l: 0 for l in self.layers}

    # loss_type == 'contrastive' branch of the PyTorch forward
    def forward_contrastive(self, inputs, reconstructions, post_mean,
                            post_logvar, split="train"):
        (self.w_m, self.b_m, d_k_all, loss, acc1, acc5) = _fused_forward(
            inputs, reconstructions, self.w_q, self.b_q, self.w_m, self.b_m,
            self.queue, post_mean, post_logvar)
        d_k = {l: d_k_all[i] for i, l in enumerate(self.layers)}
        # NOTE: matching the reference exactly, '<split>/cont_loss' logs the
        # TOTAL loss (kl + contrastive) and acc1/acc5 are the LAST layer's.
        log = {
            f"{split}/cont_loss": loss,
            f"{split}/acc1": acc1,
            f"{split}/acc5": acc5,
        }
        return loss, log, d_k

    # MoCo queue dequeue/enqueue (host-side state update, plain JAX)
    def move_pointer(self, inputs, d_k):
        n = inputs.shape[0]
        for i, l in enumerate(self.layers):
            ptr = self.queue_ptr[l]
            self.queue = self.queue.at[i, :, ptr:ptr + n].set(d_k[l].T)
            self.queue_ptr[l] = (ptr + n) % self.cont_k


# ----------------------------------- main ------------------------------------
if __name__ == "__main__":
    key = jax.random.PRNGKey(0)
    k1, k2, k3, k4, k5 = jax.random.split(key, 5)

    N, C, H, W = 8, 3, 16, 16        # image batch (NCHW)
    Zc, Zh, Zw = 4, 8, 8             # posterior latent (NCHW)

    inputs = jax.random.normal(k1, (N, C, H, W), jnp.float32)
    reconstructions = jax.random.normal(k2, (N, C, H, W), jnp.float32)
    post_mean = jax.random.normal(k3, (N, Zc, Zh, Zw), jnp.float32)
    post_logvar = 0.1 * jax.random.normal(k4, (N, Zc, Zh, Zw), jnp.float32)

    module = ContrastiveLossKL(k5, in_features=C * H * W)
    loss, log, d_k = module.forward_contrastive(
        inputs, reconstructions, post_mean, post_logvar)

    jax.block_until_ready(loss)
    for v in log.values():
        jax.block_until_ready(v)
    for v in d_k.values():
        jax.block_until_ready(v)

    # exercise the MoCo queue update once as well
    module.move_pointer(inputs, d_k)
    jax.block_until_ready(module.queue)

    print("KERNEL_OK")
</pallas_src>

<mosaic_0001>
module attributes {stable_mosaic.version = 11 : i64} {
  func.func @_fused_kernel(%arg0: memref<8x768xbf16, #tpu.memory_space<vmem>>, %arg1: memref<8x768xbf16, #tpu.memory_space<vmem>>, %arg2: memref<768x32xf32, #tpu.memory_space<vmem>>, %arg3: memref<1x32xf32, #tpu.memory_space<vmem>>, %arg4: memref<768x32xf32, #tpu.memory_space<vmem>>, %arg5: memref<1x32xf32, #tpu.memory_space<vmem>>, %arg6: memref<2x16x256xf32, #tpu.memory_space<vmem>>, %arg7: memref<8x256xf32, #tpu.memory_space<vmem>>, %arg8: memref<8x256xf32, #tpu.memory_space<vmem>>, %arg9: memref<768x32xf32, #tpu.memory_space<vmem>>, %arg10: memref<1x32xf32, #tpu.memory_space<vmem>>, %arg11: memref<2x8x16xf32, #tpu.memory_space<vmem>>, %arg12: memref<8xf32, #tpu.memory_space<smem>>) attributes {dimension_semantics = [], scalar_prefetch = 0 : i64, scratch_operands = 0 : i64, tpu.core_type = #tpu.core_type<tc>} {
    %c0 = arith.constant 0 : index
    %c0_0 = arith.constant 0 : index
    %0 = vector.load %arg2[%c0, %c0_0] : memref<768x32xf32, #tpu.memory_space<vmem>>, vector<768x32xf32>
    %c0_1 = arith.constant 0 : index
    %c0_2 = arith.constant 0 : index
    %1 = vector.load %arg3[%c0_1, %c0_2] : memref<1x32xf32, #tpu.memory_space<vmem>>, vector<1x32xf32>
    %c0_3 = arith.constant 0 : index
    %c0_4 = arith.constant 0 : index
    %2 = vector.load %arg4[%c0_3, %c0_4] : memref<768x32xf32, #tpu.memory_space<vmem>>, vector<768x32xf32>
    %cst = arith.constant 9.990000e-01 : f32
    %3 = vector.broadcast %cst : f32 to vector<768x32xf32>
    %4 = arith.mulf %2, %3 : vector<768x32xf32>
    %cst_5 = arith.constant 1.000000e-03 : f32
    %5 = vector.broadcast %cst_5 : f32 to vector<768x32xf32>
    %6 = arith.mulf %0, %5 : vector<768x32xf32>
    %7 = arith.addf %4, %6 : vector<768x32xf32>
    %c0_6 = arith.constant 0 : index
    %c0_7 = arith.constant 0 : index
    %8 = vector.load %arg5[%c0_6, %c0_7] : memref<1x32xf32, #tpu.memory_space<vmem>>, vector<1x32xf32>
    %cst_8 = arith.constant 9.990000e-01 : f32
    %9 = vector.broadcast %cst_8 : f32 to vector<1x32xf32>
    %10 = arith.mulf %8, %9 : vector<1x32xf32>
    %cst_9 = arith.constant 1.000000e-03 : f32
    %11 = vector.broadcast %cst_9 : f32 to vector<1x32xf32>
    %12 = arith.mulf %1, %11 : vector<1x32xf32>
    %13 = arith.addf %10, %12 : vector<1x32xf32>
    %c0_10 = arith.constant 0 : index
    %c0_11 = arith.constant 0 : index
    %14 = vector.load %arg9[%c0_10, %c0_11] : memref<768x32xf32, #tpu.memory_space<vmem>>, vector<768x32xf32>
    tpu.vector_store %arg9[%c0_10, %c0_11], %7 {strides = array<i32>} : memref<768x32xf32, #tpu.memory_space<vmem>>, vector<768x32xf32>,
    %c0_12 = arith.constant 0 : index
    %c0_13 = arith.constant 0 : index
    %15 = vector.load %arg10[%c0_12, %c0_13] : memref<1x32xf32, #tpu.memory_space<vmem>>, vector<1x32xf32>
    tpu.vector_store %arg10[%c0_12, %c0_13], %13 {strides = array<i32>} : memref<1x32xf32, #tpu.memory_space<vmem>>, vector<1x32xf32>,
    %c0_14 = arith.constant 0 : index
    %c0_15 = arith.constant 0 : index
    %16 = vector.load %arg0[%c0_14, %c0_15] : memref<8x768xbf16, #tpu.memory_space<vmem>>, vector<8x768xbf16>
    %17 = arith.truncf %7 : vector<768x32xf32> to vector<768x32xbf16>
    %cst_16 = arith.constant dense<0.000000e+00> : vector<8x32xf32>
    %18 = tpu.matmul %16, %17, %cst_16 {dimension_numbers = #tpu.dot_dimension_numbers<[1], [0], [0], [1], [0, 0, 1, 1], [], []>} : vector<8x768xbf16>, vector<768x32xbf16>, vector<8x32xf32> -> vector<8x32xf32>
    %19 = vector.broadcast %13 : vector<1x32xf32> to vector<8x32xf32>
    %20 = arith.addf %18, %19 : vector<8x32xf32>
    %c0_17 = arith.constant 0 : index
    %c0_18 = arith.constant 0 : index
    %21 = vector.load %arg1[%c0_17, %c0_18] : memref<8x768xbf16, #tpu.memory_space<vmem>>, vector<8x768xbf16>
    %22 = arith.truncf %0 : vector<768x32xf32> to vector<768x32xbf16>
    %cst_19 = arith.constant dense<0.000000e+00> : vector<8x32xf32>
    %23 = tpu.matmul %21, %22, %cst_19 {dimension_numbers = #tpu.dot_dimension_numbers<[1], [0], [0], [1], [0, 0, 1, 1], [], []>} : vector<8x768xbf16>, vector<768x32xbf16>, vector<8x32xf32> -> vector<8x32xf32>
    %24 = vector.broadcast %1 : vector<1x32xf32> to vector<8x32xf32>
    %25 = arith.addf %23, %24 : vector<8x32xf32>
    %26 = vector.extract_strided_slice %20 {offsets = [0, 0], sizes = [8, 16], strides = [1, 1]} : vector<8x32xf32> to vector<8x16xf32>
    %27 = vector.extract_strided_slice %25 {offsets = [0, 0], sizes = [8, 16], strides = [1, 1]} : vector<8x32xf32> to vector<8x16xf32>
    %28 = arith.mulf %26, %26 : vector<8x16xf32>
    %cst_20 = arith.constant dense<0.000000e+00> : vector<8xf32>
    %29 = vector.multi_reduction <add>, %28, %cst_20 [1] : vector<8x16xf32> to vector<8xf32>
    %30 = vector.shape_cast %29 : vector<8xf32> to vector<8x1xf32>
    %31 = math.sqrt %30 : vector<8x1xf32>
    %cst_21 = arith.constant 9.99999996E-13 : f32
    %32 = vector.broadcast %cst_21 : f32 to vector<8x1xf32>
    %33 = arith.maximumf %31, %32 : vector<8x1xf32>
    %34 = vector.broadcast %33 : vector<8x1xf32> to vector<8x16xf32>
    %35 = arith.divf %26, %34 : vector<8x16xf32>
    %36 = arith.mulf %27, %27 : vector<8x16xf32>
    %cst_22 = arith.constant dense<0.000000e+00> : vector<8xf32>
    %37 = vector.multi_reduction <add>, %36, %cst_22 [1] : vector<8x16xf32> to vector<8xf32>
    %38 = vector.shape_cast %37 : vector<8xf32> to vector<8x1xf32>
    %39 = math.sqrt %38 : vector<8x1xf32>
    %cst_23 = arith.constant 9.99999996E-13 : f32
    %40 = vector.broadcast %cst_23 : f32 to vector<8x1xf32>
    %41 = arith.maximumf %39, %40 : vector<8x1xf32>
    %42 = vector.broadcast %41 : vector<8x1xf32> to vector<8x16xf32>
    %43 = arith.divf %27, %42 : vector<8x16xf32>
    %c0_24 = arith.constant 0 : index
    %c0_25 = arith.constant 0 : index
    %c0_26 = arith.constant 0 : index
    %44 = vector.load %arg11[%c0_24, %c0_25, %c0_26] : memref<2x8x16xf32, #tpu.memory_space<vmem>>, vector<1x8x16xf32>
    %45 = vector.shape_cast %44 : vector<1x8x16xf32> to vector<8x16xf32>
    %46 = vector.shape_cast %35 : vector<8x16xf32> to vector<1x8x16xf32>
    tpu.vector_store %arg11[%c0_24, %c0_25, %c0_26], %46 {strides = array<i32>} : memref<2x8x16xf32, #tpu.memory_space<vmem>>, vector<1x8x16xf32>,
    %47 = arith.mulf %35, %43 : vector<8x16xf32>
    %cst_27 = arith.constant dense<0.000000e+00> : vector<8xf32>
    %48 = vector.multi_reduction <add>, %47, %cst_27 [1] : vector<8x16xf32> to vector<8xf32>
    %49 = vector.shape_cast %48 : vector<8xf32> to vector<8x1xf32>
    %cst_28 = arith.constant 14.2857141 : f32
    %50 = vector.broadcast %cst_28 : f32 to vector<8x1xf32>
    %51 = arith.mulf %49, %50 : vector<8x1xf32>
    %52 = arith.truncf %43 : vector<8x16xf32> to vector<8x16xbf16>
    %c0_29 = arith.constant 0 : index
    %c0_30 = arith.constant 0 : index
    %c0_31 = arith.constant 0 : index
    %53 = vector.load %arg6[%c0_29, %c0_30, %c0_31] : memref<2x16x256xf32, #tpu.memory_space<vmem>>, vector<1x16x256xf32>
    %54 = vector.shape_cast %53 : vector<1x16x256xf32> to vector<16x256xf32>
    %55 = arith.truncf %54 : vector<16x256xf32> to vector<16x256xbf16>
    %cst_32 = arith.constant dense<0.000000e+00> : vector<8x256xf32>
    %56 = tpu.matmul %52, %55, %cst_32 {dimension_numbers = #tpu.dot_dimension_numbers<[1], [0], [0], [1], [0, 0, 1, 1], [], []>} : vector<8x16xbf16>, vector<16x256xbf16>, vector<8x256xf32> -> vector<8x256xf32>
    %cst_33 = arith.constant 14.2857141 : f32
    %57 = vector.broadcast %cst_33 : f32 to vector<8x256xf32>
    %58 = arith.mulf %56, %57 : vector<8x256xf32>
    %cst_34 = arith.constant dense<0xFF800000> : vector<8xf32>
    %59 = vector.multi_reduction <maximumf>, %58, %cst_34 [1] : vector<8x256xf32> to vector<8xf32>
    %60 = vector.shape_cast %59 : vector<8xf32> to vector<8x1xf32>
    %61 = arith.maximumf %51, %60 : vector<8x1xf32>
    %62 = arith.subf %51, %61 : vector<8x1xf32>
    %63 = math.exp %62 : vector<8x1xf32>
    %64 = vector.broadcast %61 : vector<8x1xf32> to vector<8x256xf32>
    %65 = arith.subf %58, %64 : vector<8x256xf32>
    %66 = math.exp %65 : vector<8x256xf32>
    %cst_35 = arith.constant dense<0.000000e+00> : vector<8xf32>
    %67 = vector.multi_reduction <add>, %66, %cst_35 [1] : vector<8x256xf32> to vector<8xf32>
    %68 = vector.shape_cast %67 : vector<8xf32> to vector<8x1xf32>
    %69 = arith.addf %63, %68 : vector<8x1xf32>
    %70 = math.log %69 : vector<8x1xf32>
    %71 = arith.addf %61, %70 : vector<8x1xf32>
    %72 = arith.subf %71, %51 : vector<8x1xf32>
    %73 = vector.shape_cast %72 : vector<8x1xf32> to vector<1x8x1xf32>
    %cst_36 = arith.constant dense<0.000000e+00> : vector<1xf32>
    %74 = vector.multi_reduction <add>, %73, %cst_36 [1, 2] : vector<1x8x1xf32> to vector<1xf32>
    %75 = vector.shape_cast %74 : vector<1xf32> to vector<1x1x1xf32>
    %76 = vector.extract %75[0, 0, 0] : f32 from vector<1x1x1xf32>
    %cst_37 = arith.constant 6.250000e-02 : f32
    %77 = arith.mulf %76, %cst_37 : f32
    %cst_38 = arith.constant 0.000000e+00 : f32
    %78 = arith.addf %cst_38, %77 : f32
    %79 = vector.extract_strided_slice %20 {offsets = [0, 16], sizes = [8, 16], strides = [1, 1]} : vector<8x32xf32> to vector<8x16xf32>
    %80 = vector.extract_strided_slice %25 {offsets = [0, 16], sizes = [8, 16], strides = [1, 1]} : vector<8x32xf32> to vector<8x16xf32>
    %81 = arith.mulf %79, %79 : vector<8x16xf32>
    %cst_39 = arith.constant dense<0.000000e+00> : vector<8xf32>
    %82 = vector.multi_reduction <add>, %81, %cst_39 [1] : vector<8x16xf32> to vector<8xf32>
    %83 = vector.shape_cast %82 : vector<8xf32> to vector<8x1xf32>
    %84 = math.sqrt %83 : vector<8x1xf32>
    %cst_40 = arith.constant 9.99999996E-13 : f32
    %85 = vector.broadcast %cst_40 : f32 to vector<8x1xf32>
    %86 = arith.maximumf %84, %85 : vector<8x1xf32>
    %87 = vector.broadcast %86 : vector<8x1xf32> to vector<8x16xf32>
    %88 = arith.divf %79, %87 : vector<8x16xf32>
    %89 = arith.mulf %80, %80 : vector<8x16xf32>
    %cst_41 = arith.constant dense<0.000000e+00> : vector<8xf32>
    %90 = vector.multi_reduction <add>, %89, %cst_41 [1] : vector<8x16xf32> to vector<8xf32>
    %91 = vector.shape_cast %90 : vector<8xf32> to vector<8x1xf32>
    %92 = math.sqrt %91 : vector<8x1xf32>
    %cst_42 = arith.constant 9.99999996E-13 : f32
    %93 = vector.broadcast %cst_42 : f32 to vector<8x1xf32>
    %94 = arith.maximumf %92, %93 : vector<8x1xf32>
    %95 = vector.broadcast %94 : vector<8x1xf32> to vector<8x16xf32>
    %96 = arith.divf %80, %95 : vector<8x16xf32>
    %c1 = arith.constant 1 : index
    %c0_43 = arith.constant 0 : index
    %c0_44 = arith.constant 0 : index
    %97 = vector.load %arg11[%c1, %c0_43, %c0_44] : memref<2x8x16xf32, #tpu.memory_space<vmem>>, vector<1x8x16xf32>
    %98 = vector.shape_cast %97 : vector<1x8x16xf32> to vector<8x16xf32>
    %99 = vector.shape_cast %88 : vector<8x16xf32> to vector<1x8x16xf32>
    tpu.vector_store %arg11[%c1, %c0_43, %c0_44], %99 {strides = array<i32>} : memref<2x8x16xf32, #tpu.memory_space<vmem>>, vector<1x8x16xf32>,
    %100 = arith.mulf %88, %96 : vector<8x16xf32>
    %cst_45 = arith.constant dense<0.000000e+00> : vector<8xf32>
    %101 = vector.multi_reduction <add>, %100, %cst_45 [1] : vector<8x16xf32> to vector<8xf32>
    %102 = vector.shape_cast %101 : vector<8xf32> to vector<8x1xf32>
    %cst_46 = arith.constant 14.2857141 : f32
    %103 = vector.broadcast %cst_46 : f32 to vector<8x1xf32>
    %104 = arith.mulf %102, %103 : vector<8x1xf32>
    %105 = arith.truncf %96 : vector<8x16xf32> to vector<8x16xbf16>
    %c1_47 = arith.constant 1 : index
    %c0_48 = arith.constant 0 : index
    %c0_49 = arith.constant 0 : index
    %106 = vector.load %arg6[%c1_47, %c0_48, %c0_49] : memref<2x16x256xf32, #tpu.memory_space<vmem>>, vector<1x16x256xf32>
    %107 = vector.shape_cast %106 : vector<1x16x256xf32> to vector<16x256xf32>
    %108 = arith.truncf %107 : vector<16x256xf32> to vector<16x256xbf16>
    %cst_50 = arith.constant dense<0.000000e+00> : vector<8x256xf32>
    %109 = tpu.matmul %105, %108, %cst_50 {dimension_numbers = #tpu.dot_dimension_numbers<[1], [0], [0], [1], [0, 0, 1, 1], [], []>} : vector<8x16xbf16>, vector<16x256xbf16>, vector<8x256xf32> -> vector<8x256xf32>
    %cst_51 = arith.constant 14.2857141 : f32
    %110 = vector.broadcast %cst_51 : f32 to vector<8x256xf32>
    %111 = arith.mulf %109, %110 : vector<8x256xf32>
    %cst_52 = arith.constant dense<0xFF800000> : vector<8xf32>
    %112 = vector.multi_reduction <maximumf>, %111, %cst_52 [1] : vector<8x256xf32> to vector<8xf32>
    %113 = vector.shape_cast %112 : vector<8xf32> to vector<8x1xf32>
    %114 = arith.maximumf %104, %113 : vector<8x1xf32>
    %115 = arith.subf %104, %114 : vector<8x1xf32>
    %116 = math.exp %115 : vector<8x1xf32>
    %117 = vector.broadcast %114 : vector<8x1xf32> to vector<8x256xf32>
    %118 = arith.subf %111, %117 : vector<8x256xf32>
    %119 = math.exp %118 : vector<8x256xf32>
    %cst_53 = arith.constant dense<0.000000e+00> : vector<8xf32>
    %120 = vector.multi_reduction <add>, %119, %cst_53 [1] : vector<8x256xf32> to vector<8xf32>
    %121 = vector.shape_cast %120 : vector<8xf32> to vector<8x1xf32>
    %122 = arith.addf %116, %121 : vector<8x1xf32>
    %123 = math.log %122 : vector<8x1xf32>
    %124 = arith.addf %114, %123 : vector<8x1xf32>
    %125 = arith.subf %124, %104 : vector<8x1xf32>
    %126 = vector.shape_cast %125 : vector<8x1xf32> to vector<1x8x1xf32>
    %cst_54 = arith.constant dense<0.000000e+00> : vector<1xf32>
    %127 = vector.multi_reduction <add>, %126, %cst_54 [1, 2] : vector<1x8x1xf32> to vector<1xf32>
    %128 = vector.shape_cast %127 : vector<1xf32> to vector<1x1x1xf32>
    %129 = vector.extract %128[0, 0, 0] : f32 from vector<1x1x1xf32>
    %cst_55 = arith.constant 6.250000e-02 : f32
    %130 = arith.mulf %129, %cst_55 : f32
    %131 = arith.addf %78, %130 : f32
    %132 = vector.broadcast %104 : vector<8x1xf32> to vector<8x256xf32>
    %133 = arith.cmpf ogt, %111, %132 : vector<8x256xf32>
    %134 = arith.extui %133 : vector<8x256xi1> to vector<8x256xi32>
    %135 = arith.sitofp %134 : vector<8x256xi32> to vector<8x256xf32>
    %cst_56 = arith.constant dense<0.000000e+00> : vector<8xf32>
    %136 = vector.multi_reduction <add>, %135, %cst_56 [1] : vector<8x256xf32> to vector<8xf32>
    %137 = vector.shape_cast %136 : vector<8xf32> to vector<8x1xf32>
    %cst_57 = arith.constant 1.000000e+00 : f32
    %138 = vector.broadcast %cst_57 : f32 to vector<8x1xf32>
    %139 = arith.cmpf olt, %137, %138 : vector<8x1xf32>
    %140 = arith.extui %139 : vector<8x1xi1> to vector<8x1xi32>
    %141 = arith.sitofp %140 : vector<8x1xi32> to vector<8x1xf32>
    %142 = vector.shape_cast %141 : vector<8x1xf32> to vector<1x8x1xf32>
    %cst_58 = arith.constant dense<0.000000e+00> : vector<1xf32>
    %143 = vector.multi_reduction <add>, %142, %cst_58 [1, 2] : vector<1x8x1xf32> to vector<1xf32>
    %144 = vector.shape_cast %143 : vector<1xf32> to vector<1x1x1xf32>
    %145 = vector.extract %144[0, 0, 0] : f32 from vector<1x1x1xf32>
    %cst_59 = arith.constant 1.250000e+01 : f32
    %146 = arith.mulf %145, %cst_59 : f32
    %cst_60 = arith.constant 5.000000e+00 : f32
    %147 = vector.broadcast %cst_60 : f32 to vector<8x1xf32>
    %148 = arith.cmpf olt, %137, %147 : vector<8x1xf32>
    %149 = arith.extui %148 : vector<8x1xi1> to vector<8x1xi32>
    %150 = arith.sitofp %149 : vector<8x1xi32> to vector<8x1xf32>
    %151 = vector.shape_cast %150 : vector<8x1xf32> to vector<1x8x1xf32>
    %cst_61 = arith.constant dense<0.000000e+00> : vector<1xf32>
    %152 = vector.multi_reduction <add>, %151, %cst_61 [1, 2] : vector<1x8x1xf32> to vector<1xf32>
    %153 = vector.shape_cast %152 : vector<1xf32> to vector<1x1x1xf32>
    %154 = vector.extract %153[0, 0, 0] : f32 from vector<1x1x1xf32>
    %cst_62 = arith.constant 1.250000e+01 : f32
    %155 = arith.mulf %154, %cst_62 : f32
    %c0_63 = arith.constant 0 : index
    %c0_64 = arith.constant 0 : index
    %156 = vector.load %arg7[%c0_63, %c0_64] : memref<8x256xf32, #tpu.memory_space<vmem>>, vector<8x256xf32>
    %c0_65 = arith.constant 0 : index
    %c0_66 = arith.constant 0 : index
    %157 = vector.load %arg8[%c0_65, %c0_66] : memref<8x256xf32, #tpu.memory_space<vmem>>, vector<8x256xf32>
    %158 = arith.mulf %156, %156 : vector<8x256xf32>
    %159 = math.exp %157 : vector<8x256xf32>
    %160 = arith.addf %158, %159 : vector<8x256xf32>
    %cst_67 = arith.constant 1.000000e+00 : f32
    %161 = vector.broadcast %cst_67 : f32 to vector<8x256xf32>
    %162 = arith.subf %160, %161 : vector<8x256xf32>
    %163 = arith.subf %162, %157 : vector<8x256xf32>
    %164 = vector.shape_cast %163 : vector<8x256xf32> to vector<1x8x256xf32>
    %cst_68 = arith.constant dense<0.000000e+00> : vector<1xf32>
    %165 = vector.multi_reduction <add>, %164, %cst_68 [1, 2] : vector<1x8x256xf32> to vector<1xf32>
    %166 = vector.shape_cast %165 : vector<1xf32> to vector<1x1x1xf32>
    %167 = vector.extract %166[0, 0, 0] : f32 from vector<1x1x1xf32>
    %cst_69 = arith.constant 5.000000e-01 : f32
    %168 = arith.mulf %cst_69, %167 : f32
    %cst_70 = arith.constant 1.250000e-01 : f32
    %169 = arith.mulf %168, %cst_70 : f32
    %170 = arith.addf %169, %131 : f32
    %c0_71 = arith.constant 0 : index
    %171 = memref.load %arg12[%c0_71] : memref<8xf32, #tpu.memory_space<smem>>
    memref.store %170, %arg12[%c0_71] : memref<8xf32, #tpu.memory_space<smem>>
    %c1_72 = arith.constant 1 : index
    %172 = memref.load %arg12[%c1_72] : memref<8xf32, #tpu.memory_space<smem>>
    memref.store %146, %arg12[%c1_72] : memref<8xf32, #tpu.memory_space<smem>>
    %c2 = arith.constant 2 : index
    %173 = memref.load %arg12[%c2] : memref<8xf32, #tpu.memory_space<smem>>
    memref.store %155, %arg12[%c2] : memref<8xf32, #tpu.memory_space<smem>>
    %c3 = arith.constant 3 : index
    %174 = memref.load %arg12[%c3] : memref<8xf32, #tpu.memory_space<smem>>
    memref.store %169, %arg12[%c3] : memref<8xf32, #tpu.memory_space<smem>>
    %c4 = arith.constant 4 : index
    %175 = memref.load %arg12[%c4] : memref<8xf32, #tpu.memory_space<smem>>
    memref.store %131, %arg12[%c4] : memref<8xf32, #tpu.memory_space<smem>>
    %cst_73 = arith.constant 0.000000e+00 : f32
    %c5 = arith.constant 5 : index
    %176 = memref.load %arg12[%c5] : memref<8xf32, #tpu.memory_space<smem>>
    memref.store %cst_73, %arg12[%c5] : memref<8xf32, #tpu.memory_space<smem>>
    %cst_74 = arith.constant 0.000000e+00 : f32
    %c6 = arith.constant 6 : index
    %177 = memref.load %arg12[%c6] : memref<8xf32, #tpu.memory_space<smem>>
    memref.store %cst_74, %arg12[%c6] : memref<8xf32, #tpu.memory_space<smem>>
    %cst_75 = arith.constant 0.000000e+00 : f32
    %c7 = arith.constant 7 : index
    %178 = memref.load %arg12[%c7] : memref<8xf32, #tpu.memory_space<smem>>
    memref.store %cst_75, %arg12[%c7] : memref<8xf32, #tpu.memory_space<smem>>
    return
  }
}

</mosaic_0001>

<bundles_post_ra>
// kernel: _fused_forward.1
= control target key start
LH: loop header
LB: loop body
LE: loop exit
PB: predicated region body
PF: predicated region fallthrough
CT: control target
= control target key end

     0   :  { %vm523_vm0 = vcmask 261120   ;;  %s3215_s0 = inlined_call_operand.vmem [shape: bf16[8,768], index: 0, kind: input, shape index: {}]   ;;  %s3216_s1 = inlined_call_operand.vmem [shape: bf16[8,768], index: 1, kind: input, shape index: {}]   ;;  %s3217_s2 = inlined_call_operand.vmem [shape: f32[768,32], index: 2, kind: input, shape index: {}]   ;;  %s3218_s3 = inlined_call_operand.vmem [shape: f32[1,32], index: 3, kind: input, shape index: {}]   ;;  %s3219_s4 = inlined_call_operand.vmem [shape: f32[768,32], index: 4, kind: input, shape index: {}, may-alias: {4,9}]   ;;  %s3220_s5 = inlined_call_operand.vmem [shape: f32[1,32], index: 5, kind: input, shape index: {}, may-alias: {5,10}]   ;;  %s3221_s6 = inlined_call_operand.vmem [shape: f32[2,16,256], index: 6, kind: input, shape index: {}]   ;;  %s3222_s7 = inlined_call_operand.vmem [shape: f32[8,256], index: 7, kind: input, shape index: {}]   ;;  %s3223_s8 = inlined_call_operand.vmem [shape: f32[8,256], index: 8, kind: input, shape index: {}]   ;;  %s3224_s9 = inlined_call_operand.vmem [shape: f32[768,32], index: 9, kind: output, shape index: {0}, may-alias: {4,9}]   ;;  %s3225_s10 = inlined_call_operand.vmem [shape: f32[1,32], index: 10, kind: output, shape index: {1}, may-alias: {5,10}]   ;;  %s3226_s11 = inlined_call_operand.vmem [shape: f32[2,8,16], index: 11, kind: output, shape index: {2}]   ;;  %s3227_s12 = inlined_call_operand.vmem [shape: f32[8], index: 12, kind: output, shape index: {3}]  }
   0x1   :  { %v1695_v0 = vld [vmem:[%s3217_s2 + $0x80] sm:$0xff]  ;;  %v1700_v1 = vld [vmem:[%s3217_s2 + $0x88] sm:$0xff]  ;;  %v1784_v39 = vld [vmem:[%s3217_s2 + $0x90] sm:$0xff] }
   0x2   :  { %v151_v2 = vld [vmem:[%s3219_s4 + $0x80] sm:$0xff]  ;;  %v152_v3 = vld [vmem:[%s3219_s4 + $0x88] sm:$0xff]  ;;  %v343_v5 = vmul.f32 0.001, %v1695_v0  ;;  %v344_v9 = vmul.f32 0.001, %v1700_v1 }
   0x3   :  { %v247_v4 = vmul.f32 0.999, %v151_v2  ;;  %v1712_v6 = vld [vmem:[%s3217_s2 + $0x180] sm:$0xff]  ;;  %v248_v8 = vmul.f32 0.999, %v152_v3  ;;  %v1720_v10 = vld [vmem:[%s3217_s2 + $0x188] sm:$0xff] }
   0x4   :  { %v183_v11 = vld [vmem:[%s3219_s4 + $0x180] sm:$0xff]  ;;  %v184_v13 = vld [vmem:[%s3219_s4 + $0x188] sm:$0xff]  ;;  %v375_v15 = vmul.f32 0.001, %v1712_v6  ;;  %v376_v20 = vmul.f32 0.001, %v1720_v10 }
   0x5   :  { %v439_v12 = vadd.f32 %v343_v5, %v247_v4  ;;  %v279_v14 = vmul.f32 0.999, %v183_v11  ;;  %v1732_v16 = vld [vmem:[%s3217_s2] sm:$0xff]  ;;  %v440_v18 = vadd.f32 %v344_v9, %v248_v8  ;;  %v280_v19 = vmul.f32 0.999, %v184_v13  ;;  %v1740_v21 = vld [vmem:[%s3217_s2 + $0x8] sm:$0xff] }
   0x6   :  { %v135_v22 = vld [vmem:[%s3219_s4] sm:$0xff]  ;;  %v327_v26 = vmul.f32 0.001, %v1732_v16  ;;  %v328_v32 = vmul.f32 0.001, %v1740_v21  ;;  %v1768_v33 = vld [vmem:[%s3217_s2 + $0x108] sm:$0xff] }
   0x7   :  { %540 = vst.msk [vmem:[%s3224_s9 + $0x80] sm:$0xff] %vm523_vm0, %v439_v12  ;;  %v471_v23 = vadd.f32 %v375_v15, %v279_v14  ;;  %v231_v25 = vmul.f32 0.999, %v135_v22  ;;  %v1756_v27 = vld [vmem:[%s3217_s2 + $0x100] sm:$0xff]  ;;  %v633_v29 = vpack.c.bf16 %v440_v18, %v439_v12  ;;  %v472_v30 = vadd.f32 %v376_v20, %v280_v19  ;;  %v1796_v45 = vld [vmem:[%s3217_s2 + $0x98] sm:$0xff]  ;;  %v1812_v51 = vld [vmem:[%s3217_s2 + $0x190] sm:$0xff] }
   0x8   :  { %v359_v38 = vmul.f32 0.001, %v1756_v27  ;;  %v360_v44 = vmul.f32 0.001, %v1768_v33  ;;  %v345_v50 = vmul.f32 0.001, %v1784_v39 }
   0x9   :  { %v423_v35 = vadd.f32 %v327_v26, %v231_v25  ;;  %1413 = vmatprep.subr.bf16.mxu0 %v633_v29  ;;  %v649_v41 = vpack.c.bf16 %v472_v30, %v471_v23  ;;  %v346_v55 = vmul.f32 0.001, %v1796_v45  ;;  %v1822_v56 = vld [vmem:[%s3217_s2 + $0x198] sm:$0xff]  ;;  %v377_v61 = vmul.f32 0.001, %v1812_v51  ;;  %v1838_v62 = vld [vmem:[%s3217_s2 + $0x10] sm:$0xff] }
   0xa   :  { %v378_v5 = vmul.f32 0.001, %v1822_v56  ;;  %v1850_v8 = vld [vmem:[%s3217_s2 + $0x18] sm:$0xff]  ;;  %v329_v14 = vmul.f32 0.001, %v1838_v62  ;;  %v1866_v15 = vld [vmem:[%s3217_s2 + $0x110] sm:$0xff] }
   0xb   :  { %1435 = vmatprep.subr.bf16.mxu1 %v649_v41  ;;  %v330_v22 = vmul.f32 0.001, %v1850_v8  ;;  %v2282_v63 = vld [vmem:[%s3217_s2 + $0x58] sm:$0xff]  ;;  %v2336_v7 = vld [vmem:[%s3217_s2 + $0xe8] sm:$0xff] }
   0xc   :  { %v338_v40 = vmul.f32 0.001, %v2282_v63 }
   0xe   :  { %v136_v24 = vld [vmem:[%s3219_s4 + $0x8] sm:$0xff] }
   0xf   :  { %541 = vst.msk [vmem:[%s3224_s9 + $0x88] sm:$0xff] %vm523_vm0, %v440_v18  ;;  %v232_v31 = vmul.f32 0.999, %v136_v24 }
  0x11   :  { %v424_v42 = vadd.f32 %v328_v32, %v232_v31  ;;  %v1892_v31 = vld [vmem:[%s3217_s2 + $0xa0] sm:$0xff] }
  0x13   :  { %v625_v52 = vpack.c.bf16 %v424_v42, %v423_v35 }
  0x15   :  { %1414 = vmatpush3.bf16.msra.mxu0 %v625_v52 }
  0x16   :  { %v167_v34 = vld [vmem:[%s3219_s4 + $0x100] sm:$0xff] }
  0x17   :  { %572 = vst.msk [vmem:[%s3224_s9 + $0x180] sm:$0xff] %vm523_vm0, %v471_v23  ;;  %v263_v37 = vmul.f32 0.999, %v167_v34  ;;  %v1876_v23 = vld [vmem:[%s3217_s2 + $0x118] sm:$0xff] }
  0x19   :  { %v455_v47 = vadd.f32 %v359_v38, %v263_v37  ;;  %v362_v37 = vmul.f32 0.001, %v1876_v23  ;;  %v1904_v38 = vld [vmem:[%s3217_s2 + $0xa8] sm:$0xff] }
  0x1a   :  { %v348_v52 = vmul.f32 0.001, %v1904_v38 }
  0x1e   :  { %v168_v36 = vld [vmem:[%s3219_s4 + $0x108] sm:$0xff] }
  0x1f   :  { %573 = vst.msk [vmem:[%s3224_s9 + $0x188] sm:$0xff] %vm523_vm0, %v472_v30  ;;  %v264_v43 = vmul.f32 0.999, %v168_v36  ;;  %v361_v30 = vmul.f32 0.001, %v1866_v15 }
  0x21   :  { %v456_v53 = vadd.f32 %v360_v44, %v264_v43 }
  0x23   :  { %v641_v2 = vpack.c.bf16 %v456_v53, %v455_v47 }
  0x25   :  { %1436 = vmatpush3.bf16.msra.mxu1 %v641_v2 }
  0x26   :  { %v153_v46 = vld [vmem:[%s3219_s4 + $0x90] sm:$0xff] }
  0x27   :  { %524 = vst.msk [vmem:[%s3224_s9] sm:$0xff] %vm523_vm0, %v423_v35  ;;  %v249_v49 = vmul.f32 0.999, %v153_v46  ;;  %v347_v46 = vmul.f32 0.001, %v1892_v31 }
  0x29   :  { %v441_v58 = vadd.f32 %v345_v50, %v249_v49 }
  0x2e   :  { %v154_v48 = vld [vmem:[%s3219_s4 + $0x98] sm:$0xff] }
  0x2f   :  { %525 = vst.msk [vmem:[%s3224_s9 + $0x8] sm:$0xff] %vm523_vm0, %v424_v42  ;;  %v250_v54 = vmul.f32 0.999, %v154_v48 }
  0x31   :  { %v442_v3 = vadd.f32 %v346_v55, %v250_v54 }
  0x33   :  { %v634_v18 = vpack.c.bf16 %v442_v3, %v441_v58 }
  0x35   :  { %1415 = vmatprep.subr.bf16.mxu0 %v634_v18 }
  0x36   :  { %v185_v57 = vld [vmem:[%s3219_s4 + $0x190] sm:$0xff] }
  0x37   :  { %556 = vst.msk [vmem:[%s3224_s9 + $0x100] sm:$0xff] %vm523_vm0, %v455_v47  ;;  %v281_v60 = vmul.f32 0.999, %v185_v57  ;;  %v1920_v47 = vld [vmem:[%s3217_s2 + $0x1a0] sm:$0xff] }
  0x38   :  { %3252 = vst [vmem:[#allocation5_spill] sm:$0xff] %v1920_v47 }
  0x39   :  { %v473_v11 = vadd.f32 %v377_v61, %v281_v60  ;;  %v1946_v60 = vld [vmem:[%s3217_s2 + $0x20] sm:$0xff] }
  0x3a   :  { %v331_v18 = vmul.f32 0.001, %v1946_v60 }
  0x3e   :  { %v186_v59 = vld [vmem:[%s3219_s4 + $0x198] sm:$0xff] }
  0x3f   :  { %557 = vst.msk [vmem:[%s3224_s9 + $0x108] sm:$0xff] %vm523_vm0, %v456_v53  ;;  %v282_v4 = vmul.f32 0.999, %v186_v59  ;;  %v1930_v53 = vld [vmem:[%s3217_s2 + $0x1a8] sm:$0xff]  ;;  %v379_v59 = vmul.f32 0.001, %v1920_v47 }
  0x40   :  { %3253 = vst [vmem:[#allocation6_spill] sm:$0xff] %v1930_v53 }
  0x41   :  { %v474_v19 = vadd.f32 %v378_v5, %v282_v4  ;;  %v380_v5 = vmul.f32 0.001, %v1930_v53 }
  0x43   :  { %v650_v34 = vpack.c.bf16 %v474_v19, %v473_v11 }
  0x45   :  { %1437 = vmatprep.subr.bf16.mxu1 %v650_v34 }
  0x46   :  { %v137_v9 = vld [vmem:[%s3219_s4 + $0x10] sm:$0xff] }
  0x47   :  { %542 = vst.msk [vmem:[%s3224_s9 + $0x90] sm:$0xff] %vm523_vm0, %v441_v58  ;;  %v233_v13 = vmul.f32 0.999, %v137_v9  ;;  %v1958_v9 = vld [vmem:[%s3217_s2 + $0x28] sm:$0xff] }
  0x49   :  { %v425_v25 = vadd.f32 %v329_v14, %v233_v13 }
  0x4e   :  { %v138_v12 = vld [vmem:[%s3219_s4 + $0x18] sm:$0xff] }
  0x4f   :  { %543 = vst.msk [vmem:[%s3224_s9 + $0x98] sm:$0xff] %vm523_vm0, %v442_v3  ;;  %v234_v20 = vmul.f32 0.999, %v138_v12 }
  0x51   :  { %v426_v35 = vadd.f32 %v330_v22, %v234_v20 }
  0x53   :  { %v626_v48 = vpack.c.bf16 %v426_v35, %v425_v25 }
  0x55   :  { %1416 = vmatpush3.bf16.msra.mxu0 %v626_v48  ;;  %v2012_v48 = vld [vmem:[%s3217_s2 + $0xb8] sm:$0xff] }
  0x56   :  { %v169_v24 = vld [vmem:[%s3219_s4 + $0x110] sm:$0xff] }
  0x57   :  { %574 = vst.msk [vmem:[%s3224_s9 + $0x190] sm:$0xff] %vm523_vm0, %v473_v11  ;;  %v265_v29 = vmul.f32 0.999, %v169_v24 }
  0x59   :  { %v457_v42 = vadd.f32 %v361_v30, %v265_v29 }
  0x5e   :  { %v170_v26 = vld [vmem:[%s3219_s4 + $0x118] sm:$0xff] }
  0x5f   :  { %575 = vst.msk [vmem:[%s3224_s9 + $0x198] sm:$0xff] %vm523_vm0, %v474_v19  ;;  %v266_v36 = vmul.f32 0.999, %v170_v26  ;;  %v1974_v19 = vld [vmem:[%s3217_s2 + $0x120] sm:$0xff]  ;;  %v1984_v26 = vld [vmem:[%s3217_s2 + $0x128] sm:$0xff] }
  0x60   :  { %3254 = vst [vmem:[#allocation7_spill] sm:$0xff] %v1974_v19  ;;  %3255 = vst [vmem:[#allocation8_spill] sm:$0xff] %v1984_v26 }
  0x61   :  { %v458_v49 = vadd.f32 %v362_v37, %v266_v36  ;;  %v363_v36 = vmul.f32 0.001, %v1974_v19  ;;  %v2000_v37 = vld [vmem:[%s3217_s2 + $0xb0] sm:$0xff] }
  0x63   :  { %v642_v2 = vpack.c.bf16 %v458_v49, %v457_v42 }
  0x65   :  { %1438 = vmatpush3.bf16.msra.mxu1 %v642_v2 }
  0x66   :  { %v155_v41 = vld [vmem:[%s3219_s4 + $0xa0] sm:$0xff] }
  0x67   :  { %526 = vst.msk [vmem:[%s3224_s9 + $0x10] sm:$0xff] %vm523_vm0, %v425_v25  ;;  %v251_v44 = vmul.f32 0.999, %v155_v41  ;;  %v332_v25 = vmul.f32 0.001, %v1958_v9 }
  0x69   :  { %v443_v55 = vadd.f32 %v347_v46, %v251_v44  ;;  %v364_v46 = vmul.f32 0.001, %v1984_v26 }
  0x6e   :  { %v156_v43 = vld [vmem:[%s3219_s4 + $0xa8] sm:$0xff] }
  0x6f   :  { %527 = vst.msk [vmem:[%s3224_s9 + $0x18] sm:$0xff] %vm523_vm0, %v426_v35  ;;  %v252_v50 = vmul.f32 0.999, %v156_v43 }
  0x71   :  { %v444_v3 = vadd.f32 %v348_v52, %v252_v50 }
  0x73   :  { %v635_v20 = vpack.c.bf16 %v444_v3, %v443_v55 }
  0x75   :  { %1417 = vmatprep.subr.bf16.mxu0 %v635_v20  ;;  %v2228_v20 = vld [vmem:[%s3217_s2 + $0xd8] sm:$0xff] }
  0x76   :  { %v187_v54 = vld [vmem:[%s3219_s4 + $0x1a0] sm:$0xff]  ;;  %v354_v41 = vmul.f32 0.001, %v2228_v20 }
  0x77   :  { %558 = vst.msk [vmem:[%s3224_s9 + $0x110] sm:$0xff] %vm523_vm0, %v457_v42  ;;  %v283_v58 = vmul.f32 0.999, %v187_v54 }
  0x79   :  { %v475_v12 = vadd.f32 %v379_v59, %v283_v58 }
  0x7e   :  { %v188_v57 = vld [vmem:[%s3219_s4 + $0x1a8] sm:$0xff] }
  0x7f   :  { %559 = vst.msk [vmem:[%s3224_s9 + $0x118] sm:$0xff] %vm523_vm0, %v458_v49  ;;  %v284_v4 = vmul.f32 0.999, %v188_v57  ;;  %v2028_v57 = vld [vmem:[%s3217_s2 + $0x1b0] sm:$0xff] }
  0x80   :  { %3256 = vst [vmem:[#allocation9_spill] sm:$0xff] %v2028_v57 }
  0x81   :  { %v476_v22 = vadd.f32 %v380_v5, %v284_v4  ;;  %v2038_v4 = vld [vmem:[%s3217_s2 + $0x1b8] sm:$0xff] }
  0x82   :  { %3257 = vst [vmem:[#allocation10_spill] sm:$0xff] %v2038_v4 }
  0x83   :  { %v651_v42 = vpack.c.bf16 %v476_v22, %v475_v12 }
  0x85   :  { %1439 = vmatprep.subr.bf16.mxu1 %v651_v42 }
  0x86   :  { %v139_v11 = vld [vmem:[%s3219_s4 + $0x20] sm:$0xff] }
  0x87   :  { %544 = vst.msk [vmem:[%s3224_s9 + $0xa0] sm:$0xff] %vm523_vm0, %v443_v55  ;;  %v235_v14 = vmul.f32 0.999, %v139_v11  ;;  %v349_v55 = vmul.f32 0.001, %v2000_v37 }
  0x89   :  { %v427_v30 = vadd.f32 %v331_v18, %v235_v14  ;;  %v381_v14 = vmul.f32 0.001, %v2028_v57  ;;  %v2054_v18 = vld [vmem:[%s3217_s2 + $0x30] sm:$0xff]  ;;  %v2553_v57 = vld [vmem:[%s3217_s2 + $0x280] sm:$0xff] }
  0x8e   :  { %v140_v13 = vld [vmem:[%s3219_s4 + $0x28] sm:$0xff] }
  0x8f   :  { %545 = vst.msk [vmem:[%s3224_s9 + $0xa8] sm:$0xff] %vm523_vm0, %v444_v3  ;;  %v236_v24 = vmul.f32 0.999, %v140_v13  ;;  %v350_v3 = vmul.f32 0.001, %v2012_v48 }
  0x91   :  { %v428_v43 = vadd.f32 %v332_v25, %v236_v24 }
  0x93   :  { %v627_v58 = vpack.c.bf16 %v428_v43, %v427_v30 }
  0x95   :  { %1418 = vmatpush3.bf16.msra.mxu0 %v627_v58 }
  0x96   :  { %v171_v29 = vld [vmem:[%s3219_s4 + $0x120] sm:$0xff] }
  0x97   :  { %576 = vst.msk [vmem:[%s3224_s9 + $0x1a0] sm:$0xff] %vm523_vm0, %v475_v12  ;;  %v267_v35 = vmul.f32 0.999, %v171_v29  ;;  %v382_v29 = vmul.f32 0.001, %v2038_v4 }
  0x99   :  { %v459_v50 = vadd.f32 %v363_v36, %v267_v35 }
  0x9e   :  { %v172_v34 = vld [vmem:[%s3219_s4 + $0x128] sm:$0xff] }
  0x9f   :  { %577 = vst.msk [vmem:[%s3224_s9 + $0x1a8] sm:$0xff] %vm523_vm0, %v476_v22  ;;  %v268_v44 = vmul.f32 0.999, %v172_v34 }
  0xa1   :  { %v460_v59 = vadd.f32 %v364_v46, %v268_v44  ;;  %v2082_v44 = vld [vmem:[%s3217_s2 + $0x130] sm:$0xff] }
  0xa2   :  { %3258 = vst [vmem:[#allocation11_spill] sm:$0xff] %v2082_v44 }
  0xa3   :  { %v643_v22 = vpack.c.bf16 %v460_v59, %v459_v50 }
  0xa5   :  { %1440 = vmatpush3.bf16.msra.mxu1 %v643_v22 }
  0xa6   :  { %v157_v49 = vld [vmem:[%s3219_s4 + $0xb0] sm:$0xff] }
  0xa7   :  { %528 = vst.msk [vmem:[%s3224_s9 + $0x20] sm:$0xff] %vm523_vm0, %v427_v30  ;;  %v253_v54 = vmul.f32 0.999, %v157_v49  ;;  %v2066_v30 = vld [vmem:[%s3217_s2 + $0x38] sm:$0xff] }
  0xa9   :  { %v445_v11 = vadd.f32 %v349_v55, %v253_v54  ;;  %v2092_v54 = vld [vmem:[%s3217_s2 + $0x138] sm:$0xff] }
  0xaa   :  { %3259 = vst [vmem:[#allocation12_spill] sm:$0xff] %v2092_v54  ;;  %v366_v22 = vmul.f32 0.001, %v2092_v54  ;;  %v623_v54 = vld [vmem:[%s3215_s0 + $0x8] sm:$0xff] }
  0xab   :  { %v1390_v4 = vcombine.low %v623_v54, %v623_v54 }
  0xae   :  { %v158_v52 = vld [vmem:[%s3219_s4 + $0xb8] sm:$0xff] }
  0xaf   :  { %529 = vst.msk [vmem:[%s3224_s9 + $0x28] sm:$0xff] %vm523_vm0, %v428_v43  ;;  %v254_v2 = vmul.f32 0.999, %v158_v52  ;;  %v333_v43 = vmul.f32 0.001, %v2054_v18 }
  0xb0   :  { %v334_v52 = vmul.f32 0.001, %v2066_v30 }
  0xb1   :  { %v446_v24 = vadd.f32 %v350_v3, %v254_v2  ;;  %v365_v3 = vmul.f32 0.001, %v2082_v44 }
  0xb3   :  { %v636_v46 = vpack.c.bf16 %v446_v24, %v445_v11 }
  0xb5   :  { %1419 = vmatprep.subr.bf16.mxu0 %v636_v46 }
  0xb6   :  { %v189_v5 = vld [vmem:[%s3219_s4 + $0x1b0] sm:$0xff] }
  0xb7   :  { %560 = vst.msk [vmem:[%s3224_s9 + $0x120] sm:$0xff] %vm523_vm0, %v459_v50  ;;  %v285_v13 = vmul.f32 0.999, %v189_v5  ;;  %v2108_v5 = vld [vmem:[%s3217_s2 + $0xc0] sm:$0xff] }
  0xb9   :  { %v477_v35 = vadd.f32 %v381_v14, %v285_v13 }
  0xbe   :  { %v190_v12 = vld [vmem:[%s3219_s4 + $0x1b8] sm:$0xff] }
  0xbf   :  { %561 = vst.msk [vmem:[%s3224_s9 + $0x128] sm:$0xff] %vm523_vm0, %v460_v59  ;;  %v286_v25 = vmul.f32 0.999, %v190_v12 }
  0xc1   :  { %v478_v49 = vadd.f32 %v382_v29, %v286_v25 }
  0xc3   :  { %v652_v12 = vpack.c.bf16 %v478_v49, %v477_v35 }
  0xc5   :  { %1441 = vmatprep.subr.bf16.mxu1 %v652_v12  ;;  %v2162_v12 = vld [vmem:[%s3217_s2 + $0x40] sm:$0xff] }
  0xc6   :  { %v141_v34 = vld [vmem:[%s3219_s4 + $0x30] sm:$0xff] }
  0xc7   :  { %546 = vst.msk [vmem:[%s3224_s9 + $0xb0] sm:$0xff] %vm523_vm0, %v445_v11  ;;  %v237_v42 = vmul.f32 0.999, %v141_v34 }
  0xc9   :  { %v429_v58 = vadd.f32 %v333_v43, %v237_v42  ;;  %v2136_v42 = vld [vmem:[%s3217_s2 + $0x1c0] sm:$0xff] }
  0xca   :  { %3260 = vst [vmem:[#allocation13_spill] sm:$0xff] %v2136_v42 }
  0xce   :  { %v142_v36 = vld [vmem:[%s3219_s4 + $0x38] sm:$0xff] }
  0xcf   :  { %547 = vst.msk [vmem:[%s3224_s9 + $0xb8] sm:$0xff] %vm523_vm0, %v446_v24  ;;  %v238_v50 = vmul.f32 0.999, %v142_v36  ;;  %v2120_v24 = vld [vmem:[%s3217_s2 + $0xc8] sm:$0xff]  ;;  %v351_v36 = vmul.f32 0.001, %v2108_v5 }
  0xd1   :  { %v430_v13 = vadd.f32 %v334_v52, %v238_v50  ;;  %v352_v50 = vmul.f32 0.001, %v2120_v24  ;;  %v2146_v52 = vld [vmem:[%s3217_s2 + $0x1c8] sm:$0xff] }
  0xd2   :  { %3261 = vst [vmem:[#allocation14_spill] sm:$0xff] %v2146_v52 }
  0xd3   :  { %v628_v43 = vpack.c.bf16 %v430_v13, %v429_v58 }
  0xd5   :  { %1420 = vmatpush3.bf16.msra.mxu0 %v628_v43 }
  0xd6   :  { %v173_v55 = vld [vmem:[%s3219_s4 + $0x130] sm:$0xff] }
  0xd7   :  { %578 = vst.msk [vmem:[%s3224_s9 + $0x1b0] sm:$0xff] %vm523_vm0, %v477_v35  ;;  %v269_v2 = vmul.f32 0.999, %v173_v55 }
  0xd9   :  { %v461_v29 = vadd.f32 %v365_v3, %v269_v2  ;;  %v383_v3 = vmul.f32 0.001, %v2136_v42 }
  0xde   :  { %v174_v59 = vld [vmem:[%s3219_s4 + $0x138] sm:$0xff] }
  0xdf   :  { %579 = vst.msk [vmem:[%s3224_s9 + $0x1b8] sm:$0xff] %vm523_vm0, %v478_v49  ;;  %v270_v14 = vmul.f32 0.999, %v174_v59 }
  0xe1   :  { %v462_v46 = vadd.f32 %v366_v22, %v270_v14 }
  0xe3   :  { %v644_v14 = vpack.c.bf16 %v462_v46, %v461_v29 }
  0xe5   :  { %1442 = vmatpush3.bf16.msra.mxu1 %v644_v14 }
  0xe6   :  { %v159_v25 = vld [vmem:[%s3219_s4 + $0xc0] sm:$0xff] }
  0xe7   :  { %530 = vst.msk [vmem:[%s3224_s9 + $0x30] sm:$0xff] %vm523_vm0, %v429_v58  ;;  %v255_v35 = vmul.f32 0.999, %v159_v25 }
  0xe9   :  { %v447_v59 = vadd.f32 %v351_v36, %v255_v35  ;;  %v2174_v35 = vld [vmem:[%s3217_s2 + $0x48] sm:$0xff] }
  0xee   :  { %v160_v34 = vld [vmem:[%s3219_s4 + $0xc8] sm:$0xff] }
  0xef   :  { %531 = vst.msk [vmem:[%s3224_s9 + $0x38] sm:$0xff] %vm523_vm0, %v430_v13  ;;  %v256_v49 = vmul.f32 0.999, %v160_v34  ;;  %v384_v34 = vmul.f32 0.001, %v2146_v52  ;;  %v2498_v52 = vld [vmem:[%s3217_s2 + $0x78] sm:$0xff] }
  0xf1   :  { %v448_v22 = vadd.f32 %v352_v50, %v256_v49  ;;  %v335_v49 = vmul.f32 0.001, %v2162_v12  ;;  %v2190_v50 = vld [vmem:[%s3217_s2 + $0x140] sm:$0xff] }
  0xf2   :  { %3262 = vst [vmem:[#allocation15_spill] sm:$0xff] %v2190_v50 }
  0xf6   :  { %v191_v55 = vld [vmem:[%s3219_s4 + $0x1c0] sm:$0xff] }
  0xf7   :  { %562 = vst.msk [vmem:[%s3224_s9 + $0x130] sm:$0xff] %vm523_vm0, %v461_v29  ;;  %v287_v2 = vmul.f32 0.999, %v191_v55  ;;  %v637_v55 = vpack.c.bf16 %v448_v22, %v447_v59 }
  0xf9   :  { %v479_v43 = vadd.f32 %v383_v3, %v287_v2  ;;  %v336_v3 = vmul.f32 0.001, %v2174_v35  ;;  %1421 = vmatprep.subr.bf16.mxu0 %v637_v55 }
  0xfe   :  { %v192_v58 = vld [vmem:[%s3219_s4 + $0x1c8] sm:$0xff] }
  0xff   :  { %563 = vst.msk [vmem:[%s3224_s9 + $0x138] sm:$0xff] %vm523_vm0, %v462_v46  ;;  %v288_v25 = vmul.f32 0.999, %v192_v58 }
 0x101   :  { %v480_v58 = vadd.f32 %v384_v34, %v288_v25  ;;  %v367_v25 = vmul.f32 0.001, %v2190_v50  ;;  %v2216_v34 = vld [vmem:[%s3217_s2 + $0xd0] sm:$0xff] }
 0x106   :  { %v143_v36 = vld [vmem:[%s3219_s4 + $0x40] sm:$0xff] }
 0x107   :  { %548 = vst.msk [vmem:[%s3224_s9 + $0xc0] sm:$0xff] %vm523_vm0, %v447_v59  ;;  %v239_v46 = vmul.f32 0.999, %v143_v36  ;;  %v2200_v36 = vld [vmem:[%s3217_s2 + $0x148] sm:$0xff] }
 0x108   :  { %3263 = vst [vmem:[#allocation16_spill] sm:$0xff] %v2200_v36 }
 0x109   :  { %v431_v14 = vadd.f32 %v335_v49, %v239_v46  ;;  %v653_v46 = vpack.c.bf16 %v480_v58, %v479_v43 }
 0x10b   :  { %1443 = vmatprep.subr.bf16.mxu1 %v653_v46 }
 0x10e   :  { %v144_v29 = vld [vmem:[%s3219_s4 + $0x48] sm:$0xff] }
 0x10f   :  { %549 = vst.msk [vmem:[%s3224_s9 + $0xc8] sm:$0xff] %vm523_vm0, %v448_v22  ;;  %v240_v2 = vmul.f32 0.999, %v144_v29 }
 0x111   :  { %v432_v49 = vadd.f32 %v336_v3, %v240_v2  ;;  %v353_v2 = vmul.f32 0.001, %v2216_v34  ;;  %v2244_v3 = vld [vmem:[%s3217_s2 + $0x1d0] sm:$0xff] }
 0x112   :  { %3264 = vst [vmem:[#allocation17_spill] sm:$0xff] %v2244_v3 }
 0x116   :  { %v175_v13 = vld [vmem:[%s3219_s4 + $0x140] sm:$0xff] }
 0x117   :  { %580 = vst.msk [vmem:[%s3224_s9 + $0x1c0] sm:$0xff] %vm523_vm0, %v479_v43  ;;  %v271_v22 = vmul.f32 0.999, %v175_v13  ;;  %v368_v13 = vmul.f32 0.001, %v2200_v36  ;;  %v2444_v36 = vld [vmem:[%s3217_s2 + $0xf8] sm:$0xff] }
 0x119   :  { %v463_v55 = vadd.f32 %v367_v25, %v271_v22 }
 0x11e   :  { %v176_v59 = vld [vmem:[%s3219_s4 + $0x148] sm:$0xff] }
 0x11f   :  { %581 = vst.msk [vmem:[%s3224_s9 + $0x1c8] sm:$0xff] %vm523_vm0, %v480_v58  ;;  %v272_v11 = vmul.f32 0.999, %v176_v59  ;;  %v629_v59 = vpack.c.bf16 %v432_v49, %v431_v14 }
 0x121   :  { %v464_v22 = vadd.f32 %v368_v13, %v272_v11  ;;  %v2270_v13 = vld [vmem:[%s3217_s2 + $0x50] sm:$0xff]  ;;  %1422 = vmatpush3.bf16.msra.mxu0 %v629_v59 }
 0x126   :  { %v161_v29 = vld [vmem:[%s3219_s4 + $0xd0] sm:$0xff] }
 0x127   :  { %532 = vst.msk [vmem:[%s3224_s9 + $0x40] sm:$0xff] %vm523_vm0, %v431_v14  ;;  %v257_v58 = vmul.f32 0.999, %v161_v29  ;;  %v2254_v29 = vld [vmem:[%s3217_s2 + $0x1d8] sm:$0xff] }
 0x128   :  { %3265 = vst [vmem:[#allocation18_spill] sm:$0xff] %v2254_v29 }
 0x129   :  { %v449_v46 = vadd.f32 %v353_v2, %v257_v58  ;;  %v645_v58 = vpack.c.bf16 %v464_v22, %v463_v55 }
 0x12b   :  { %1444 = vmatpush3.bf16.msra.mxu1 %v645_v58 }
 0x12e   :  { %v162_v43 = vld [vmem:[%s3219_s4 + $0xd8] sm:$0xff] }
 0x12f   :  { %533 = vst.msk [vmem:[%s3224_s9 + $0x48] sm:$0xff] %vm523_vm0, %v432_v49  ;;  %v258_v25 = vmul.f32 0.999, %v162_v43  ;;  %v385_v49 = vmul.f32 0.001, %v2244_v3 }
 0x131   :  { %v450_v2 = vadd.f32 %v354_v41, %v258_v25  ;;  %v2298_v25 = vld [vmem:[%s3217_s2 + $0x150] sm:$0xff] }
 0x132   :  { %3266 = vst [vmem:[#allocation19_spill] sm:$0xff] %v2298_v25 }
 0x136   :  { %v193_v61 = vld [vmem:[%s3219_s4 + $0x1d0] sm:$0xff] }
 0x137   :  { %564 = vst.msk [vmem:[%s3224_s9 + $0x140] sm:$0xff] %vm523_vm0, %v463_v55  ;;  %v289_v14 = vmul.f32 0.999, %v193_v61  ;;  %v386_v61 = vmul.f32 0.001, %v2254_v29  ;;  %v2390_v29 = vld [vmem:[%s3217_s2 + $0x68] sm:$0xff] }
 0x139   :  { %v481_v59 = vadd.f32 %v385_v49, %v289_v14 }
 0x13e   :  { %v194_v11 = vld [vmem:[%s3219_s4 + $0x1d8] sm:$0xff] }
 0x13f   :  { %565 = vst.msk [vmem:[%s3224_s9 + $0x148] sm:$0xff] %vm523_vm0, %v464_v22  ;;  %v290_v32 = vmul.f32 0.999, %v194_v11  ;;  %v337_v22 = vmul.f32 0.001, %v2270_v13  ;;  %v638_v11 = vpack.c.bf16 %v450_v2, %v449_v46 }
 0x141   :  { %v482_v14 = vadd.f32 %v386_v61, %v290_v32  ;;  %v2324_v61 = vld [vmem:[%s3217_s2 + $0xe0] sm:$0xff]  ;;  %1423 = vmatprep.subr.bf16.mxu0 %v638_v11 }
 0x146   :  { %v145_v43 = vld [vmem:[%s3219_s4 + $0x50] sm:$0xff] }
 0x147   :  { %550 = vst.msk [vmem:[%s3224_s9 + $0xd0] sm:$0xff] %vm523_vm0, %v449_v46  ;;  %v241_v55 = vmul.f32 0.999, %v145_v43  ;;  %v2308_v43 = vld [vmem:[%s3217_s2 + $0x158] sm:$0xff] }
 0x148   :  { %3267 = vst [vmem:[#allocation20_spill] sm:$0xff] %v2308_v43 }
 0x149   :  { %v433_v58 = vadd.f32 %v337_v22, %v241_v55  ;;  %v654_v55 = vpack.c.bf16 %v482_v14, %v481_v59 }
 0x14b   :  { %1445 = vmatprep.subr.bf16.mxu1 %v654_v55 }
 0x14e   :  { %v146_v41 = vld [vmem:[%s3219_s4 + $0x58] sm:$0xff] }
 0x14f   :  { %551 = vst.msk [vmem:[%s3224_s9 + $0xd8] sm:$0xff] %vm523_vm0, %v450_v2  ;;  %v242_v49 = vmul.f32 0.999, %v146_v41  ;;  %v369_v2 = vmul.f32 0.001, %v2298_v25 }
 0x150   :  { %v356_v25 = vmul.f32 0.001, %v2336_v7 }
 0x151   :  { %v434_v22 = vadd.f32 %v338_v40, %v242_v49  ;;  %v2352_v49 = vld [vmem:[%s3217_s2 + $0x1e0] sm:$0xff] }
 0x152   :  { %3268 = vst [vmem:[#allocation21_spill] sm:$0xff] %v2352_v49 }
 0x156   :  { %v177_v17 = vld [vmem:[%s3219_s4 + $0x150] sm:$0xff] }
 0x157   :  { %582 = vst.msk [vmem:[%s3224_s9 + $0x1d0] sm:$0xff] %vm523_vm0, %v481_v59  ;;  %v273_v46 = vmul.f32 0.999, %v177_v17  ;;  %v370_v17 = vmul.f32 0.001, %v2308_v43 }
 0x159   :  { %v465_v11 = vadd.f32 %v369_v2, %v273_v46 }
 0x15e   :  { %v178_v32 = vld [vmem:[%s3219_s4 + $0x158] sm:$0xff] }
 0x15f   :  { %583 = vst.msk [vmem:[%s3224_s9 + $0x1d8] sm:$0xff] %vm523_vm0, %v482_v14  ;;  %v274_v28 = vmul.f32 0.999, %v178_v32  ;;  %v355_v14 = vmul.f32 0.001, %v2324_v61  ;;  %v630_v32 = vpack.c.bf16 %v434_v22, %v433_v58 }
 0x161   :  { %v466_v46 = vadd.f32 %v370_v17, %v274_v28  ;;  %v2378_v17 = vld [vmem:[%s3217_s2 + $0x60] sm:$0xff]  ;;  %1424 = vmatpush3.bf16.msra.mxu0 %v630_v32 }
 0x166   :  { %v163_v41 = vld [vmem:[%s3219_s4 + $0xe0] sm:$0xff] }
 0x167   :  { %534 = vst.msk [vmem:[%s3224_s9 + $0x50] sm:$0xff] %vm523_vm0, %v433_v58  ;;  %v259_v59 = vmul.f32 0.999, %v163_v41  ;;  %v2362_v41 = vld [vmem:[%s3217_s2 + $0x1e8] sm:$0xff] }
 0x168   :  { %3269 = vst [vmem:[#allocation22_spill] sm:$0xff] %v2362_v41 }
 0x169   :  { %v451_v55 = vadd.f32 %v355_v14, %v259_v59  ;;  %v646_v59 = vpack.c.bf16 %v466_v46, %v465_v11 }
 0x16b   :  { %1446 = vmatpush3.bf16.msra.mxu1 %v646_v59 }
 0x16e   :  { %v164_v40 = vld [vmem:[%s3219_s4 + $0xe8] sm:$0xff] }
 0x16f   :  { %535 = vst.msk [vmem:[%s3224_s9 + $0x58] sm:$0xff] %vm523_vm0, %v434_v22  ;;  %v260_v2 = vmul.f32 0.999, %v164_v40  ;;  %v387_v22 = vmul.f32 0.001, %v2352_v49 }
 0x170   :  { %v340_v49 = vmul.f32 0.001, %v2390_v29 }
 0x171   :  { %v452_v14 = vadd.f32 %v356_v25, %v260_v2  ;;  %v2406_v2 = vld [vmem:[%s3217_s2 + $0x160] sm:$0xff] }
 0x172   :  { %3270 = vst [vmem:[#allocation23_spill] sm:$0xff] %v2406_v2 }
 0x176   :  { %v195_v43 = vld [vmem:[%s3219_s4 + $0x1e0] sm:$0xff] }
 0x177   :  { %566 = vst.msk [vmem:[%s3224_s9 + $0x150] sm:$0xff] %vm523_vm0, %v465_v11  ;;  %v291_v58 = vmul.f32 0.999, %v195_v43  ;;  %v388_v43 = vmul.f32 0.001, %v2362_v41 }
 0x179   :  { %v483_v32 = vadd.f32 %v387_v22, %v291_v58 }
 0x17e   :  { %v196_v28 = vld [vmem:[%s3219_s4 + $0x1e8] sm:$0xff] }
 0x17f   :  { %567 = vst.msk [vmem:[%s3224_s9 + $0x158] sm:$0xff] %vm523_vm0, %v466_v46  ;;  %v292_v3 = vmul.f32 0.999, %v196_v28  ;;  %v339_v46 = vmul.f32 0.001, %v2378_v17  ;;  %v639_v28 = vpack.c.bf16 %v452_v14, %v451_v55 }
 0x181   :  { %v484_v58 = vadd.f32 %v388_v43, %v292_v3  ;;  %v2432_v43 = vld [vmem:[%s3217_s2 + $0xf0] sm:$0xff]  ;;  %1425 = vmatprep.subr.bf16.mxu0 %v639_v28 }
 0x186   :  { %v147_v40 = vld [vmem:[%s3219_s4 + $0x60] sm:$0xff] }
 0x187   :  { %552 = vst.msk [vmem:[%s3224_s9 + $0xe0] sm:$0xff] %vm523_vm0, %v451_v55  ;;  %v243_v11 = vmul.f32 0.999, %v147_v40  ;;  %v2416_v40 = vld [vmem:[%s3217_s2 + $0x168] sm:$0xff] }
 0x188   :  { %3271 = vst [vmem:[#allocation24_spill] sm:$0xff] %v2416_v40 }
 0x189   :  { %v435_v59 = vadd.f32 %v339_v46, %v243_v11  ;;  %v655_v11 = vpack.c.bf16 %v484_v58, %v483_v32 }
 0x18b   :  { %1447 = vmatprep.subr.bf16.mxu1 %v655_v11 }
 0x18e   :  { %v148_v25 = vld [vmem:[%s3219_s4 + $0x68] sm:$0xff] }
 0x18f   :  { %553 = vst.msk [vmem:[%s3224_s9 + $0xe8] sm:$0xff] %vm523_vm0, %v452_v14  ;;  %v244_v22 = vmul.f32 0.999, %v148_v25  ;;  %v371_v14 = vmul.f32 0.001, %v2406_v2 }
 0x190   :  { %v358_v2 = vmul.f32 0.001, %v2444_v36 }
 0x191   :  { %v436_v46 = vadd.f32 %v340_v49, %v244_v22  ;;  %v2460_v22 = vld [vmem:[%s3217_s2 + $0x1f0] sm:$0xff] }
 0x192   :  { %3272 = vst [vmem:[#allocation25_spill] sm:$0xff] %v2460_v22 }
 0x196   :  { %v179_v41 = vld [vmem:[%s3219_s4 + $0x160] sm:$0xff] }
 0x197   :  { %584 = vst.msk [vmem:[%s3224_s9 + $0x1e0] sm:$0xff] %vm523_vm0, %v483_v32  ;;  %v275_v55 = vmul.f32 0.999, %v179_v41  ;;  %v372_v41 = vmul.f32 0.001, %v2416_v40 }
 0x199   :  { %v467_v28 = vadd.f32 %v371_v14, %v275_v55 }
 0x19e   :  { %v180_v3 = vld [vmem:[%s3219_s4 + $0x168] sm:$0xff] }
 0x19f   :  { %585 = vst.msk [vmem:[%s3224_s9 + $0x1e8] sm:$0xff] %vm523_vm0, %v484_v58  ;;  %v276_v50 = vmul.f32 0.999, %v180_v3  ;;  %v357_v58 = vmul.f32 0.001, %v2432_v43  ;;  %v631_v3 = vpack.c.bf16 %v436_v46, %v435_v59 }
 0x1a1   :  { %v468_v55 = vadd.f32 %v372_v41, %v276_v50  ;;  %v2486_v41 = vld [vmem:[%s3217_s2 + $0x70] sm:$0xff]  ;;  %1426 = vmatpush3.bf16.msra.mxu0 %v631_v3 }
 0x1a6   :  { %v165_v25 = vld [vmem:[%s3219_s4 + $0xf0] sm:$0xff] }
 0x1a7   :  { %536 = vst.msk [vmem:[%s3224_s9 + $0x60] sm:$0xff] %vm523_vm0, %v435_v59  ;;  %v261_v32 = vmul.f32 0.999, %v165_v25  ;;  %v2470_v25 = vld [vmem:[%s3217_s2 + $0x1f8] sm:$0xff] }
 0x1a8   :  { %3273 = vst [vmem:[#allocation26_spill] sm:$0xff] %v2470_v25 }
 0x1a9   :  { %v453_v11 = vadd.f32 %v357_v58, %v261_v32  ;;  %v647_v32 = vpack.c.bf16 %v468_v55, %v467_v28 }
 0x1ab   :  { %1448 = vmatpush3.bf16.msra.mxu1 %v647_v32 }
 0x1ae   :  { %v166_v49 = vld [vmem:[%s3219_s4 + $0xf8] sm:$0xff] }
 0x1af   :  { %537 = vst.msk [vmem:[%s3224_s9 + $0x68] sm:$0xff] %vm523_vm0, %v436_v46  ;;  %v262_v14 = vmul.f32 0.999, %v166_v49  ;;  %v389_v46 = vmul.f32 0.001, %v2460_v22 }
 0x1b0   :  { %v342_v22 = vmul.f32 0.001, %v2498_v52 }
 0x1b1   :  { %v454_v58 = vadd.f32 %v358_v2, %v262_v14  ;;  %v2514_v14 = vld [vmem:[%s3217_s2 + $0x170] sm:$0xff] }
 0x1b2   :  { %3274 = vst [vmem:[#allocation27_spill] sm:$0xff] %v2514_v14 }
 0x1b6   :  { %v197_v40 = vld [vmem:[%s3219_s4 + $0x1f0] sm:$0xff] }
 0x1b7   :  { %568 = vst.msk [vmem:[%s3224_s9 + $0x160] sm:$0xff] %vm523_vm0, %v467_v28  ;;  %v293_v59 = vmul.f32 0.999, %v197_v40  ;;  %v390_v40 = vmul.f32 0.001, %v2470_v25 }
 0x1b9   :  { %v485_v3 = vadd.f32 %v389_v46, %v293_v59 }
 0x1be   :  { %v198_v50 = vld [vmem:[%s3219_s4 + $0x1f8] sm:$0xff] }
 0x1bf   :  { %569 = vst.msk [vmem:[%s3224_s9 + $0x168] sm:$0xff] %vm523_vm0, %v468_v55  ;;  %v294_v42 = vmul.f32 0.999, %v198_v50  ;;  %v341_v55 = vmul.f32 0.001, %v2486_v41  ;;  %v640_v50 = vpack.c.bf16 %v454_v58, %v453_v11 }
 0x1c1   :  { %v486_v59 = vadd.f32 %v390_v40, %v294_v42  ;;  %v622_v40 = vld [vmem:[%s3215_s0] sm:$0xff]  ;;  %1427 = vmatprep.subr.bf16.mxu0 %v640_v50 }
 0x1c6   :  { %v149_v49 = vld [vmem:[%s3219_s4 + $0x70] sm:$0xff] }
 0x1c7   :  { %554 = vst.msk [vmem:[%s3224_s9 + $0xf0] sm:$0xff] %vm523_vm0, %v453_v11  ;;  %v245_v28 = vmul.f32 0.999, %v149_v49  ;;  %v2524_v49 = vld [vmem:[%s3217_s2 + $0x178] sm:$0xff] }
 0x1c8   :  { %3275 = vst [vmem:[#allocation28_spill] sm:$0xff] %v2524_v49 }
 0x1c9   :  { %v437_v32 = vadd.f32 %v341_v55, %v245_v28  ;;  %v656_v28 = vpack.c.bf16 %v486_v59, %v485_v3 }
 0x1cb   :  { %1449 = vmatprep.subr.bf16.mxu1 %v656_v28 }
 0x1ce   :  { %v150_v2 = vld [vmem:[%s3219_s4 + $0x78] sm:$0xff] }
 0x1cf   :  { %555 = vst.msk [vmem:[%s3224_s9 + $0xf8] sm:$0xff] %vm523_vm0, %v454_v58  ;;  %v246_v46 = vmul.f32 0.999, %v150_v2  ;;  %v373_v58 = vmul.f32 0.001, %v2514_v14  ;;  %v2577_v14 = vld [vmem:[%s3217_s2 + $0x200] sm:$0xff] }
 0x1d1   :  { %v438_v55 = vadd.f32 %v342_v22, %v246_v46  ;;  %v2562_v22 = vld [vmem:[%s3217_s2 + $0x288] sm:$0xff] }
 0x1d6   :  { %v181_v25 = vld [vmem:[%s3219_s4 + $0x170] sm:$0xff] }
 0x1d7   :  { %586 = vst.msk [vmem:[%s3224_s9 + $0x1f0] sm:$0xff] %vm523_vm0, %v485_v3  ;;  %v277_v11 = vmul.f32 0.999, %v181_v25  ;;  %v374_v25 = vmul.f32 0.001, %v2524_v49  ;;  %v1389_v3 = vcombine.high %v622_v40, %v622_v40  ;;  %v2582_v49 = vld [vmem:[%s3217_s2 + $0x208] sm:$0xff] }
 0x1d8   :  { %v392_v53 = vmul.f32 0.001, %v2582_v49 }
 0x1d9   :  { %v469_v50 = vadd.f32 %v373_v58, %v277_v11  ;;  %v1391_v58 = vcombine.high %v623_v54, %v623_v54  ;;  %732 = vmatprep.mubr.bf16.mxu0 %v1389_v3  ;;  %v391_v3 = vmul.f32 0.001, %v2577_v14  ;;  %v2610_v54 = vld [vmem:[%s3217_s2 + $0x298] sm:$0xff] }
 0x1db   :  { %772 = vmatprep.mubr.bf16.mxu1 %v1391_v58 }
 0x1de   :  { %v182_v42 = vld [vmem:[%s3219_s4 + $0x178] sm:$0xff] }
 0x1df   :  { %587 = vst.msk [vmem:[%s3224_s9 + $0x1f8] sm:$0xff] %vm523_vm0, %v486_v59  ;;  %v278_v44 = vmul.f32 0.999, %v182_v42  ;;  %538 = vst.msk [vmem:[%s3224_s9 + $0x70] sm:$0xff] %vm523_vm0, %v437_v32  ;;  %v632_v42 = vpack.c.bf16 %v438_v55, %v437_v32 }
 0x1e1   :  { %v470_v11 = vadd.f32 %v374_v25, %v278_v44  ;;  %v1388_v44 = vcombine.low %v622_v40, %v622_v40  ;;  %v408_v25 = vmul.f32 0.001, %v2562_v22  ;;  %1428 = vmatpush3.bf16.msra.mxu0 %v632_v42 }
 0x1e4   :  { %733 = vmatmul.mubr.bf16.vlgmr.msra.gmra.mrb[0].mxu0 %v1388_v44  ;;  %v2641_v44 = vld [vmem:[%s3217_s2 + $0x218] sm:$0xff] }
 0x1e6   :  { %v215_v59 = vld [vmem:[%s3219_s4 + $0x280] sm:$0xff]  ;;  %v216_v46 = vld [vmem:[%s3219_s4 + $0x288] sm:$0xff] }
 0x1e7   :  { %539 = vst.msk [vmem:[%s3224_s9 + $0x78] sm:$0xff] %vm523_vm0, %v438_v55  ;;  %v311_v2 = vmul.f32 0.999, %v215_v59  ;;  %v312_v32 = vmul.f32 0.999, %v216_v46  ;;  %v648_v59 = vpack.c.bf16 %v470_v11, %v469_v50  ;;  %v2604_v46 = vld [vmem:[%s3217_s2 + $0x290] sm:$0xff] }
 0x1e8   :  { %v407_v55 = vmul.f32 0.001, %v2553_v57 }
 0x1e9   :  { %v504_v26 = vadd.f32 %v408_v25, %v312_v32  ;;  %1450 = vmatpush3.bf16.msra.mxu1 %v648_v59  ;;  %v2624_v32 = vld [vmem:[%s3217_s2 + $0x210] sm:$0xff]  ;;  %v410_v59 = vmul.f32 0.001, %v2610_v54 }
 0x1ea   :  { %v503_v42 = vadd.f32 %v407_v55, %v311_v2 }
 0x1ec   :  { %v665_v55 = vpack.c.bf16 %v504_v26, %v503_v42  ;;  %773 = vmatmul.mubr.bf16.vlgmr.msra.gmra.mrb[0].mxu1 %v1390_v4  ;;  %v3277_v4 = vpack.c.bf16 %v1740_v21, %v1732_v16  ;;  %v2690_v16 = vld [vmem:[%s3217_s2 + $0x220] sm:$0xff] }
 0x1ee   :  { %v199_v28 = vld [vmem:[%s3219_s4 + $0x200] sm:$0xff]  ;;  %1457 = vmatprep.subr.bf16.mxu0 %v665_v55 }
 0x1ef   :  { %570 = vst.msk [vmem:[%s3224_s9 + $0x170] sm:$0xff] %vm523_vm0, %v469_v50  ;;  %571 = vst.msk [vmem:[%s3224_s9 + $0x178] sm:$0xff] %vm523_vm0, %v470_v11  ;;  %v295_v40 = vmul.f32 0.999, %v199_v28  ;;  %v832_v28 = vpack.c.bf16 %v1796_v45, %v1784_v39  ;;  %v3276_v39 = vpack.c.bf16 %v1700_v1, %v1695_v0 }
 0x1f1   :  { %v487_v11 = vadd.f32 %v391_v3, %v295_v40  ;;  %1479 = vmatprep.subr.bf16.mxu1 %v3276_v39  ;;  %v2659_v3 = vld [vmem:[%s3217_s2 + $0x2a0] sm:$0xff] }
 0x1f2   :  { %1480 = vmatpush3.bf16.msra.mxu1 %v3277_v4  ;;  %v411_v39 = vmul.f32 0.001, %v2659_v3 }
 0x1f3   :  { %1481 = vmatprep.subr.bf16.mxu1 %v832_v28 }
 0x1f6   :  { %v200_v19 = vld [vmem:[%s3219_s4 + $0x208] sm:$0xff]  ;;  %v217_v50 = vld [vmem:[%s3219_s4 + $0x290] sm:$0xff]  ;;  %v218_v58 = vld [vmem:[%s3219_s4 + $0x298] sm:$0xff] }
 0x1f7   :  { %v296_v47 = vmul.f32 0.999, %v200_v19  ;;  %v313_v2 = vmul.f32 0.999, %v217_v50  ;;  %v409_v19 = vmul.f32 0.001, %v2604_v46 }
 0x1f8   :  { %604 = vst.msk [vmem:[%s3224_s9 + $0x280] sm:$0xff] %vm523_vm0, %v503_v42  ;;  %605 = vst.msk [vmem:[%s3224_s9 + $0x288] sm:$0xff] %vm523_vm0, %v504_v26  ;;  %v314_v25 = vmul.f32 0.999, %v218_v58  ;;  %v824_v26 = vpack.c.bf16 %v1850_v8, %v1838_v62  ;;  %v2669_v62 = vld [vmem:[%s3217_s2 + $0x2a8] sm:$0xff] }
 0x1f9   :  { %v488_v45 = vadd.f32 %v392_v53, %v296_v47  ;;  %v505_v0 = vadd.f32 %v409_v19, %v313_v2  ;;  %v393_v53 = vmul.f32 0.001, %v2624_v32  ;;  %v394_v2 = vmul.f32 0.001, %v2641_v44 }
 0x1fa   :  { %v506_v50 = vadd.f32 %v410_v59, %v314_v25  ;;  %1482 = vmatpush3.bf16.msra.mxu1 %v824_v26  ;;  %v2746_v26 = vld [vmem:[%s3217_s2 + $0x230] sm:$0xff] }
 0x1fb   :  { %v657_v42 = vpack.c.bf16 %v488_v45, %v487_v11 }
 0x1fc   :  { %v666_v21 = vpack.c.bf16 %v506_v50, %v505_v0 }
 0x1fd   :  { %1458 = vmatpush3.bf16.msra.mxu0 %v657_v42  ;;  %v2718_v42 = vld [vmem:[%s3217_s2 + $0x2b0] sm:$0xff] }
 0x1fe   :  { %1459 = vmatprep.subr.bf16.mxu0 %v666_v21 }
 0x1ff   :  { %v201_v40 = vld [vmem:[%s3219_s4 + $0x210] sm:$0xff] }
 0x200   :  { %588 = vst.msk [vmem:[%s3224_s9 + $0x200] sm:$0xff] %vm523_vm0, %v487_v11  ;;  %v297_v47 = vmul.f32 0.999, %v201_v40  ;;  %v412_v40 = vmul.f32 0.001, %v2669_v62 }
 0x202   :  { %v489_v11 = vadd.f32 %v393_v53, %v297_v47  ;;  %v395_v47 = vmul.f32 0.001, %v2690_v16  ;;  %v825_v53 = vpack.c.bf16 %v1958_v9, %v1946_v60  ;;  %v2728_v60 = vld [vmem:[%s3217_s2 + $0x2b8] sm:$0xff] }
 0x207   :  { %v202_v1 = vld [vmem:[%s3219_s4 + $0x218] sm:$0xff] }
 0x208   :  { %589 = vst.msk [vmem:[%s3224_s9 + $0x208] sm:$0xff] %vm523_vm0, %v488_v45  ;;  %v298_v58 = vmul.f32 0.999, %v202_v1  ;;  %v833_v45 = vpack.c.bf16 %v1904_v38, %v1892_v31  ;;  %v2700_v31 = vld [vmem:[%s3217_s2 + $0x228] sm:$0xff] }
 0x20a   :  { %v490_v25 = vadd.f32 %v394_v2, %v298_v58  ;;  %1483 = vmatprep.subr.bf16.mxu1 %v833_v45 }
 0x20b   :  { %1484 = vmatpush3.bf16.msra.mxu1 %v825_v53  ;;  %v2802_v53 = vld [vmem:[%s3217_s2 + $0x240] sm:$0xff] }
 0x20f   :  { %v219_v8 = vld [vmem:[%s3219_s4 + $0x2a0] sm:$0xff] }
 0x210   :  { %606 = vst.msk [vmem:[%s3224_s9 + $0x290] sm:$0xff] %vm523_vm0, %v505_v0  ;;  %v315_v55 = vmul.f32 0.999, %v219_v8  ;;  %v396_v8 = vmul.f32 0.001, %v2700_v31 }
 0x212   :  { %v507_v0 = vadd.f32 %v411_v39, %v315_v55  ;;  %v413_v55 = vmul.f32 0.001, %v2718_v42  ;;  %v834_v39 = vpack.c.bf16 %v2012_v48, %v2000_v37  ;;  %v2756_v37 = vld [vmem:[%s3217_s2 + $0x238] sm:$0xff] }
 0x214   :  { %1485 = vmatprep.subr.bf16.mxu1 %v834_v39 }
 0x217   :  { %v220_v19 = vld [vmem:[%s3219_s4 + $0x2a8] sm:$0xff] }
 0x218   :  { %607 = vst.msk [vmem:[%s3224_s9 + $0x298] sm:$0xff] %vm523_vm0, %v506_v50  ;;  %v316_v59 = vmul.f32 0.999, %v220_v19  ;;  %v658_v50 = vpack.c.bf16 %v490_v25, %v489_v11 }
 0x21a   :  { %v508_v58 = vadd.f32 %v412_v40, %v316_v59  ;;  %1460 = vmatpush3.bf16.msra.mxu0 %v658_v50  ;;  %v414_v40 = vmul.f32 0.001, %v2728_v60 }
 0x21c   :  { %v667_v21 = vpack.c.bf16 %v508_v58, %v507_v0 }
 0x21e   :  { %1461 = vmatprep.subr.bf16.mxu0 %v667_v21 }
 0x21f   :  { %v203_v38 = vld [vmem:[%s3219_s4 + $0x220] sm:$0xff] }
 0x220   :  { %590 = vst.msk [vmem:[%s3224_s9 + $0x210] sm:$0xff] %vm523_vm0, %v489_v11  ;;  %v299_v1 = vmul.f32 0.999, %v203_v38 }
 0x222   :  { %v491_v4 = vadd.f32 %v395_v47, %v299_v1  ;;  %v826_v1 = vpack.c.bf16 %v2066_v30, %v2054_v18  ;;  %v2774_v47 = vld [vmem:[%s3217_s2 + $0x2c0] sm:$0xff]  ;;  %v2784_v18 = vld [vmem:[%s3217_s2 + $0x2c8] sm:$0xff] }
 0x224   :  { %1486 = vmatpush3.bf16.msra.mxu1 %v826_v1  ;;  %v2858_v1 = vld [vmem:[%s3217_s2 + $0x250] sm:$0xff] }
 0x227   :  { %v204_v28 = vld [vmem:[%s3219_s4 + $0x228] sm:$0xff] }
 0x228   :  { %591 = vst.msk [vmem:[%s3224_s9 + $0x218] sm:$0xff] %vm523_vm0, %v490_v25  ;;  %v300_v2 = vmul.f32 0.999, %v204_v28  ;;  %v397_v28 = vmul.f32 0.001, %v2746_v26 }
 0x22a   :  { %v492_v25 = vadd.f32 %v396_v8, %v300_v2  ;;  %v398_v8 = vmul.f32 0.001, %v2756_v37 }
 0x22c   :  { %v659_v50 = vpack.c.bf16 %v492_v25, %v491_v4 }
 0x22e   :  { %1462 = vmatpush3.bf16.msra.mxu0 %v659_v50 }
 0x22f   :  { %v221_v9 = vld [vmem:[%s3219_s4 + $0x2b0] sm:$0xff] }
 0x230   :  { %608 = vst.msk [vmem:[%s3224_s9 + $0x2a0] sm:$0xff] %vm523_vm0, %v507_v0  ;;  %v317_v19 = vmul.f32 0.999, %v221_v9 }
 0x232   :  { %v509_v38 = vadd.f32 %v413_v55, %v317_v19  ;;  %v415_v19 = vmul.f32 0.001, %v2774_v47  ;;  %v835_v55 = vpack.c.bf16 %v2120_v24, %v2108_v5  ;;  %v2812_v5 = vld [vmem:[%s3217_s2 + $0x248] sm:$0xff] }
 0x234   :  { %1487 = vmatprep.subr.bf16.mxu1 %v835_v55 }
 0x237   :  { %v222_v11 = vld [vmem:[%s3219_s4 + $0x2b8] sm:$0xff] }
 0x238   :  { %609 = vst.msk [vmem:[%s3224_s9 + $0x2a8] sm:$0xff] %vm523_vm0, %v508_v58  ;;  %v318_v59 = vmul.f32 0.999, %v222_v11 }
 0x23a   :  { %v510_v58 = vadd.f32 %v414_v40, %v318_v59  ;;  %v416_v40 = vmul.f32 0.001, %v2784_v18 }
 0x23c   :  { %v668_v21 = vpack.c.bf16 %v510_v58, %v509_v38 }
 0x23e   :  { %1463 = vmatprep.subr.bf16.mxu0 %v668_v21 }
 0x23f   :  { %v205_v48 = vld [vmem:[%s3219_s4 + $0x230] sm:$0xff] }
 0x240   :  { %592 = vst.msk [vmem:[%s3224_s9 + $0x220] sm:$0xff] %vm523_vm0, %v491_v4  ;;  %v301_v0 = vmul.f32 0.999, %v205_v48 }
 0x242   :  { %v493_v9 = vadd.f32 %v397_v28, %v301_v0  ;;  %v827_v0 = vpack.c.bf16 %v2174_v35, %v2162_v12  ;;  %v2830_v28 = vld [vmem:[%s3217_s2 + $0x2d0] sm:$0xff]  ;;  %v2840_v12 = vld [vmem:[%s3217_s2 + $0x2d8] sm:$0xff] }
 0x244   :  { %1488 = vmatpush3.bf16.msra.mxu1 %v827_v0  ;;  %v2914_v0 = vld [vmem:[%s3217_s2 + $0x260] sm:$0xff] }
 0x247   :  { %v206_v45 = vld [vmem:[%s3219_s4 + $0x238] sm:$0xff] }
 0x248   :  { %593 = vst.msk [vmem:[%s3224_s9 + $0x228] sm:$0xff] %vm523_vm0, %v492_v25  ;;  %v302_v2 = vmul.f32 0.999, %v206_v45  ;;  %v399_v45 = vmul.f32 0.001, %v2802_v53 }
 0x24a   :  { %v494_v25 = vadd.f32 %v398_v8, %v302_v2  ;;  %v400_v8 = vmul.f32 0.001, %v2812_v5 }
 0x24c   :  { %v660_v50 = vpack.c.bf16 %v494_v25, %v493_v9 }
 0x24e   :  { %1464 = vmatpush3.bf16.msra.mxu0 %v660_v50 }
 0x24f   :  { %v223_v30 = vld [vmem:[%s3219_s4 + $0x2c0] sm:$0xff] }
 0x250   :  { %610 = vst.msk [vmem:[%s3224_s9 + $0x2b0] sm:$0xff] %vm523_vm0, %v509_v38  ;;  %v319_v11 = vmul.f32 0.999, %v223_v30 }
 0x252   :  { %v511_v48 = vadd.f32 %v415_v19, %v319_v11  ;;  %v417_v11 = vmul.f32 0.001, %v2830_v28  ;;  %v836_v19 = vpack.c.bf16 %v2228_v20, %v2216_v34  ;;  %v2868_v20 = vld [vmem:[%s3217_s2 + $0x258] sm:$0xff] }
 0x254   :  { %1489 = vmatprep.subr.bf16.mxu1 %v836_v19 }
 0x257   :  { %v224_v4 = vld [vmem:[%s3219_s4 + $0x2c8] sm:$0xff] }
 0x258   :  { %611 = vst.msk [vmem:[%s3224_s9 + $0x2b8] sm:$0xff] %vm523_vm0, %v510_v58  ;;  %v320_v59 = vmul.f32 0.999, %v224_v4 }
 0x25a   :  { %v512_v58 = vadd.f32 %v416_v40, %v320_v59  ;;  %v418_v40 = vmul.f32 0.001, %v2840_v12 }
 0x25c   :  { %v669_v21 = vpack.c.bf16 %v512_v58, %v511_v48 }
 0x25e   :  { %1465 = vmatprep.subr.bf16.mxu0 %v669_v21 }
 0x25f   :  { %v207_v24 = vld [vmem:[%s3219_s4 + $0x240] sm:$0xff] }
 0x260   :  { %594 = vst.msk [vmem:[%s3224_s9 + $0x230] sm:$0xff] %vm523_vm0, %v493_v9  ;;  %v303_v38 = vmul.f32 0.999, %v207_v24 }
 0x262   :  { %v495_v30 = vadd.f32 %v399_v45, %v303_v38  ;;  %v828_v38 = vpack.c.bf16 %v2282_v63, %v2270_v13  ;;  %v2886_v45 = vld [vmem:[%s3217_s2 + $0x2e0] sm:$0xff]  ;;  %v2896_v63 = vld [vmem:[%s3217_s2 + $0x2e8] sm:$0xff] }
 0x264   :  { %1490 = vmatpush3.bf16.msra.mxu1 %v828_v38  ;;  %v2970_v38 = vld [vmem:[%s3217_s2 + $0x270] sm:$0xff] }
 0x267   :  { %v208_v39 = vld [vmem:[%s3219_s4 + $0x248] sm:$0xff] }
 0x268   :  { %595 = vst.msk [vmem:[%s3224_s9 + $0x238] sm:$0xff] %vm523_vm0, %v494_v25  ;;  %v304_v2 = vmul.f32 0.999, %v208_v39  ;;  %v401_v39 = vmul.f32 0.001, %v2858_v1 }
 0x26a   :  { %v496_v25 = vadd.f32 %v400_v8, %v304_v2  ;;  %v402_v8 = vmul.f32 0.001, %v2868_v20 }
 0x26c   :  { %v661_v50 = vpack.c.bf16 %v496_v25, %v495_v30 }
 0x26e   :  { %1466 = vmatpush3.bf16.msra.mxu0 %v661_v50 }
 0x26f   :  { %v225_v35 = vld [vmem:[%s3219_s4 + $0x2d0] sm:$0xff] }
 0x270   :  { %612 = vst.msk [vmem:[%s3224_s9 + $0x2c0] sm:$0xff] %vm523_vm0, %v511_v48  ;;  %v321_v4 = vmul.f32 0.999, %v225_v35 }
 0x272   :  { %v513_v24 = vadd.f32 %v417_v11, %v321_v4  ;;  %v419_v4 = vmul.f32 0.001, %v2886_v45  ;;  %v837_v11 = vpack.c.bf16 %v2336_v7, %v2324_v61  ;;  %v2924_v7 = vld [vmem:[%s3217_s2 + $0x268] sm:$0xff] }
 0x274   :  { %1491 = vmatprep.subr.bf16.mxu1 %v837_v11 }
 0x277   :  { %v226_v9 = vld [vmem:[%s3219_s4 + $0x2d8] sm:$0xff] }
 0x278   :  { %613 = vst.msk [vmem:[%s3224_s9 + $0x2c8] sm:$0xff] %vm523_vm0, %v512_v58  ;;  %v322_v59 = vmul.f32 0.999, %v226_v9 }
 0x27a   :  { %v514_v58 = vadd.f32 %v418_v40, %v322_v59  ;;  %v420_v40 = vmul.f32 0.001, %v2896_v63 }
 0x27c   :  { %v670_v21 = vpack.c.bf16 %v514_v58, %v513_v24 }
 0x27e   :  { %1467 = vmatprep.subr.bf16.mxu0 %v670_v21 }
 0x27f   :  { %v209_v34 = vld [vmem:[%s3219_s4 + $0x250] sm:$0xff] }
 0x280   :  { %596 = vst.msk [vmem:[%s3224_s9 + $0x240] sm:$0xff] %vm523_vm0, %v495_v30  ;;  %v305_v48 = vmul.f32 0.999, %v209_v34 }
 0x282   :  { %v497_v35 = vadd.f32 %v401_v39, %v305_v48  ;;  %v829_v48 = vpack.c.bf16 %v2390_v29, %v2378_v17  ;;  %v2942_v39 = vld [vmem:[%s3217_s2 + $0x2f0] sm:$0xff]  ;;  %v2952_v29 = vld [vmem:[%s3217_s2 + $0x2f8] sm:$0xff] }
 0x284   :  { %1492 = vmatpush3.bf16.msra.mxu1 %v829_v48 }
 0x287   :  { %v210_v55 = vld [vmem:[%s3219_s4 + $0x258] sm:$0xff] }
 0x288   :  { %597 = vst.msk [vmem:[%s3224_s9 + $0x248] sm:$0xff] %vm523_vm0, %v496_v25  ;;  %v306_v2 = vmul.f32 0.999, %v210_v55  ;;  %v403_v55 = vmul.f32 0.001, %v2914_v0 }
 0x28a   :  { %v498_v25 = vadd.f32 %v402_v8, %v306_v2  ;;  %v404_v8 = vmul.f32 0.001, %v2924_v7 }
 0x28c   :  { %v662_v50 = vpack.c.bf16 %v498_v25, %v497_v35 }
 0x28e   :  { %1468 = vmatpush3.bf16.msra.mxu0 %v662_v50 }
 0x28f   :  { %v227_v13 = vld [vmem:[%s3219_s4 + $0x2e0] sm:$0xff] }
 0x290   :  { %614 = vst.msk [vmem:[%s3224_s9 + $0x2d0] sm:$0xff] %vm523_vm0, %v513_v24  ;;  %v323_v9 = vmul.f32 0.999, %v227_v13 }
 0x292   :  { %v515_v34 = vadd.f32 %v419_v4, %v323_v9  ;;  %v421_v9 = vmul.f32 0.001, %v2942_v39  ;;  %v838_v4 = vpack.c.bf16 %v2444_v36, %v2432_v43  ;;  %v2980_v36 = vld [vmem:[%s3217_s2 + $0x278] sm:$0xff] }
 0x297   :  { %v228_v30 = vld [vmem:[%s3219_s4 + $0x2e8] sm:$0xff] }
 0x298   :  { %615 = vst.msk [vmem:[%s3224_s9 + $0x2d8] sm:$0xff] %vm523_vm0, %v514_v58  ;;  %v324_v59 = vmul.f32 0.999, %v228_v30 }
 0x29a   :  { %v516_v58 = vadd.f32 %v420_v40, %v324_v59  ;;  %v422_v40 = vmul.f32 0.001, %v2952_v29 }
 0x29c   :  { %v671_v21 = vpack.c.bf16 %v516_v58, %v515_v34 }
 0x29e   :  { %1469 = vmatprep.subr.bf16.mxu0 %v671_v21 }
 0x29f   :  { %v211_v61 = vld [vmem:[%s3219_s4 + $0x260] sm:$0xff] }
 0x2a0   :  { %598 = vst.msk [vmem:[%s3224_s9 + $0x250] sm:$0xff] %vm523_vm0, %v497_v35  ;;  %v307_v24 = vmul.f32 0.999, %v211_v61 }
 0x2a2   :  { %v499_v13 = vadd.f32 %v403_v55, %v307_v24  ;;  %v624_v24 = vld [vmem:[%s3215_s0 + $0x10] sm:$0xff] }
 0x2a7   :  { %v212_v19 = vld [vmem:[%s3219_s4 + $0x268] sm:$0xff] }
 0x2a8   :  { %599 = vst.msk [vmem:[%s3224_s9 + $0x258] sm:$0xff] %vm523_vm0, %v498_v25  ;;  %v308_v2 = vmul.f32 0.999, %v212_v19  ;;  %v405_v19 = vmul.f32 0.001, %v2970_v38 }
 0x2aa   :  { %v500_v25 = vadd.f32 %v404_v8, %v308_v2  ;;  %v406_v2 = vmul.f32 0.001, %v2980_v36  ;;  %v820_v8 = vld [vmem:[%s3216_s1] sm:$0xff] }
 0x2ac   :  { %v663_v55 = vpack.c.bf16 %v500_v25, %v499_v13 }
 0x2af   :  { %v229_v17 = vld [vmem:[%s3219_s4 + $0x2f0] sm:$0xff] }
 0x2b0   :  { %616 = vst.msk [vmem:[%s3224_s9 + $0x2e0] sm:$0xff] %vm523_vm0, %v515_v34  ;;  %v325_v30 = vmul.f32 0.999, %v229_v17 }
 0x2b2   :  { %v517_v61 = vadd.f32 %v421_v9, %v325_v30  ;;  %v1393_v30 = vcombine.high %v624_v24, %v624_v24 }
 0x2b7   :  { %v230_v35 = vld [vmem:[%s3219_s4 + $0x2f8] sm:$0xff] }
 0x2b8   :  { %617 = vst.msk [vmem:[%s3224_s9 + $0x2e8] sm:$0xff] %vm523_vm0, %v516_v58  ;;  %v326_v59 = vmul.f32 0.999, %v230_v35  ;;  %v830_v35 = vpack.c.bf16 %v2498_v52, %v2486_v41 }
 0x2ba   :  { %v518_v50 = vadd.f32 %v422_v40, %v326_v59 }
 0x2bf   :  { %v213_v43 = vld [vmem:[%s3219_s4 + $0x270] sm:$0xff] }
 0x2c0   :  { %600 = vst.msk [vmem:[%s3224_s9 + $0x260] sm:$0xff] %vm523_vm0, %v499_v13  ;;  %v309_v34 = vmul.f32 0.999, %v213_v43  ;;  %v863_v13 = vpack.c.bf16 %v2562_v22, %v2553_v57 }
 0x2c2   :  { %v501_v17 = vadd.f32 %v405_v19, %v309_v34 }
 0x2c7   :  { %v214_v11 = vld [vmem:[%s3219_s4 + $0x278] sm:$0xff] }
 0x2c8   :  { %601 = vst.msk [vmem:[%s3224_s9 + $0x268] sm:$0xff] %vm523_vm0, %v500_v25  ;;  %v310_v58 = vmul.f32 0.999, %v214_v11  ;;  %618 = vst.msk [vmem:[%s3224_s9 + $0x2f0] sm:$0xff] %vm523_vm0, %v517_v61 }
 0x2c9   :  { %18 = vsyncpa [#allocation3], 0  ;;  %1470 = vmatpush3.bf16.msra.mxu0 %v663_v55  ;;  %619 = vst.msk [vmem:[%s3224_s9 + $0x2f8] sm:$0xff] %vm523_vm0, %v518_v50  ;;  %v672_v48 = vpack.c.bf16 %v518_v50, %v517_v61  ;;  %1493 = vmatprep.subr.bf16.mxu1 %v838_v4  ;;  %v1395_v21 = vcombine.high %v820_v8, %v820_v8  ;;  %v821_v41 = vld [vmem:[%s3216_s1 + $0x8] sm:$0xff]  ;;  %v822_v25 = vld [vmem:[%s3216_s1 + $0x10] sm:$0xff]  ;;  %vm620_vm1 = vcmask 253952  }
 0x2ca   :  { %v502_v9 = vadd.f32 %v406_v2, %v310_v58  ;;  %602 = vst.msk [vmem:[%s3224_s9 + $0x270] sm:$0xff] %vm523_vm0, %v501_v17  ;;  %812 = vmatprep.mubr.bf16.mxu0 %v1393_v30  ;;  %v1394_v52 = vcombine.low %v820_v8, %v820_v8  ;;  %1494 = vmatpush3.bf16.msra.mxu1 %v830_v35  ;;  %v3292_v11 = vld [vmem:[#allocation11_spill] sm:$0xff]  ;;  %v3295_v19 = vld [vmem:[#allocation13_spill] sm:$0xff]  ;;  %vm1019_vm2 = vcmask 130048   ;;  %vm1127_vm13 = vcmask 7168   ;;  %s1373_s22 = sshll.u32 %s3227_s12, 4  ;;  %s1374_s22 = int_to_ptr.vmem [resolvable:$true] %s1373_s22 }
 0x2cb   :  { %1471 = vmatprep.subr.bf16.mxu0 %v672_v48  ;;  %930 = vmatprep.mubr.bf16.mxu1 %v1395_v21  ;;  %v1392_v22 = vcombine.low %v624_v24, %v624_v24  ;;  %v855_v4 = vpack.c.bf16 %v2582_v49, %v2577_v14  ;;  %v864_v59 = vpack.c.bf16 %v2610_v54, %v2604_v46  ;;  %v3298_v55 = vld [vmem:[#allocation15_spill] sm:$0xff]  ;;  %v3301_v58 = vld [vmem:[#allocation17_spill] sm:$0xff]  ;;  %s1608_s26 = scalar_lea.vmem %s1374_s22, 16  ;;  %p1613_p1 = scmp.lt.s32.totalorder %s1374_s22, %s1374_s22 }
 0x2cc   :  { %603 = vst.msk [vmem:[%s3224_s9 + $0x278] sm:$0xff] %vm523_vm0, %v502_v9  ;;  %v664_v57 = vpack.c.bf16 %v502_v9, %v501_v17  ;;  %1523 = vmatprep.subr.bf16.mxu1 %v863_v13  ;;  %v3278_v40 = vpack.c.bf16 %v1720_v10, %v1712_v6  ;;  %v1397_v43 = vcombine.high %v821_v41, %v821_v41  ;;  %v3304_v8 = vld [vmem:[#allocation19_spill] sm:$0xff]  ;;  %v3307_v35 = vld [vmem:[#allocation21_spill] sm:$0xff]  ;;  %p1609_p0 = scmp.ne.s32.totalorder %s1374_s22, %s1608_s26  ;;  %p1614_p2 = scmp.lt.s32.totalorder %s1608_s26, %s1608_s26 }
 0x2cd   :  { %931 = vmatmul.mubr.bf16.vlgmr.msra.gmra.mrb[4].mxu1 %v1394_v52  ;;  %v1399_v61 = vcombine.high %v822_v25, %v822_v25  ;;  %v856_v14 = vpack.c.bf16 %v2641_v44, %v2624_v32  ;;  %v3279_v49 = vpack.c.bf16 %v1768_v33, %v1756_v27  ;;  %v865_v46 = vpack.c.bf16 %v2669_v62, %v2659_v3  ;;  %v3282_v33 = vld [vmem:[#allocation6_spill] sm:$0xff]  ;;  %v3283_v32 = vld [vmem:[#allocation5_spill] sm:$0xff]  ;;  %v3286_v3 = vld [vmem:[#allocation7_spill] sm:$0xff] }
 0x2ce   :  { %1472 = vmatpush3.bf16.msra.mxu0 %v664_v57  ;;  %1524 = vmatpush3.bf16.msra.mxu1 %v855_v4  ;;  %v3280_v6 = vpack.c.bf16 %v1822_v56, %v1812_v51  ;;  %v857_v10 = vpack.c.bf16 %v2700_v31, %v2690_v16  ;;  %v3281_v54 = vpack.c.bf16 %v1876_v23, %v1866_v15  ;;  %v3285_v56 = vld [vmem:[#allocation8_spill] sm:$0xff]  ;;  %v3288_v23 = vld [vmem:[#allocation10_spill] sm:$0xff]  ;;  %v3289_v16 = vld [vmem:[#allocation9_spill] sm:$0xff]  ;;  %p1615_p3 = por %p1614_p2, %p1613_p1 }
 0x2cf   :  { %1501 = vmatprep.subr.bf16.mxu0 %v3278_v40  ;;  %1525 = vmatprep.subr.bf16.mxu1 %v864_v59  ;;  %v866_v27 = vpack.c.bf16 %v2728_v60, %v2718_v42  ;;  %v3284_v44 = vpack.c.bf16 %v3282_v33, %v3283_v32  ;;  %v858_v51 = vpack.c.bf16 %v2756_v37, %v2746_v26  ;;  %v3291_v60 = vld [vmem:[#allocation12_spill] sm:$0xff]  ;;  %v3294_v37 = vld [vmem:[#allocation14_spill] sm:$0xff]  ;;  %v3310_v13 = vld [vmem:[#allocation23_spill] sm:$0xff] }
 0x2d0   :  { %1010 = vmatprep.mubr.bf16.mxu1 %v1399_v61  ;;  %v3287_v62 = vpack.c.bf16 %v3285_v56, %v3286_v3  ;;  %v867_v15 = vpack.c.bf16 %v2784_v18, %v2774_v47  ;;  %v3290_v31 = vpack.c.bf16 %v3288_v23, %v3289_v16  ;;  %v859_v42 = vpack.c.bf16 %v2812_v5, %v2802_v53  ;;  %v3297_v18 = vld [vmem:[#allocation16_spill] sm:$0xff]  ;;  %v3300_v5 = vld [vmem:[#allocation18_spill] sm:$0xff]  ;;  %v3316_v57 = vld [vmem:[#allocation27_spill] sm:$0xff]  ;;  %v1429_v61 = vpop.f32.mrb[0].mxu0  ;;  %p1616_p4 = pnand %p1615_p3, %p1609_p0 }
 0x2d1   :  { %813 = vmatmul.mubr.bf16.vlgmr.msra.gmra.mrb[4].mxu0 %v1392_v22  ;;  %v3293_v34 = vpack.c.bf16 %v3291_v60, %v3292_v11  ;;  %v868_v26 = vpack.c.bf16 %v2840_v12, %v2830_v28  ;;  %v3296_v24 = vpack.c.bf16 %v3294_v37, %v3295_v19  ;;  %v860_v47 = vpack.c.bf16 %v2868_v20, %v2858_v1  ;;  %v3303_v12 = vld [vmem:[#allocation20_spill] sm:$0xff]  ;;  %v3306_v20 = vld [vmem:[#allocation22_spill] sm:$0xff] }
 0x2d2   :  { %1502 = vmatpush3.bf16.msra.mxu0 %v3279_v49  ;;  %970 = vmatprep.mubr.bf16.mxu0 %v1397_v43  ;;  %v3299_v50 = vpack.c.bf16 %v3297_v18, %v3298_v55  ;;  %v869_v53 = vpack.c.bf16 %v2896_v63, %v2886_v45  ;;  %v3302_v2 = vpack.c.bf16 %v3300_v5, %v3301_v58  ;;  %v3309_v63 = vld [vmem:[#allocation24_spill] sm:$0xff]  ;;  %v674_v22 = vlaneseq  ;;  %v1451_v49 = vpop.f32.mrb[0].mxu1 }
 0x2d3   :  { %1503 = vmatprep.subr.bf16.mxu0 %v3280_v6  ;;  %1526 = vmatpush3.bf16.msra.mxu1 %v856_v14  ;;  %v861_v28 = vpack.c.bf16 %v2924_v7, %v2914_v0  ;;  %v3305_v17 = vpack.c.bf16 %v3303_v12, %v3304_v8  ;;  %v870_v1 = vpack.c.bf16 %v2952_v29, %v2942_v39  ;;  %v3312_v0 = vld [vmem:[#allocation26_spill] sm:$0xff]  ;;  %v3313_v7 = vld [vmem:[#allocation25_spill] sm:$0xff]  ;;  %v3315_v29 = vld [vmem:[#allocation28_spill] sm:$0xff]  ;;  %v1430_v14 = vpop.f32.mrb[1].mxu0 }
 0x2d4   :  { %1527 = vmatprep.subr.bf16.mxu1 %v865_v46  ;;  %v3308_v30 = vpack.c.bf16 %v3306_v20, %v3307_v35  ;;  %v862_v45 = vpack.c.bf16 %v2980_v36, %v2970_v38  ;;  %v3311_v48 = vpack.c.bf16 %v3309_v63, %v3310_v13  ;;  %v3314_v9 = vpack.c.bf16 %v3312_v0, %v3313_v7  ;;  %v134_v38 = vld [vmem:[%s3218_s3] sm:$0x1]  ;;  %v1432_v6 = vpop.f32.mrb[2].mxu0  ;;  %s1622_s3 = smov 112   ;;  %v1057_v20 = vld [vmem:[%s3221_s6 + $0x18] sm:$0xff] }
 0x2d5   :  { %v1398_v21 = vcombine.low %v822_v25, %v822_v25  ;;  %v1396_v39 = vcombine.low %v821_v41, %v821_v41  ;;  %v3317_v52 = vpack.c.bf16 %v3315_v29, %v3316_v57  ;;  %v519_v36 = vld [vmem:[%s3220_s5] sm:$0x1]  ;;  %v521_v59 = vmul.f32 0.001, %v134_v38 }
 0x2d6   :  { %1504 = vmatpush3.bf16.msra.mxu0 %v3281_v54  ;;  %v520_v4 = vmul.f32 0.999, %v519_v36  ;;  %v675_v25 = vshrl.u32 %v674_v22, 7  ;;  %v1431_v46 = vadd.f32 %v1430_v14, %v1429_v61  ;;  %v1433_v54 = vpop.f32.mrb[3].mxu0  ;;  %v1054_v35 = vld [vmem:[%s3221_s6] sm:$0xff]  ;;  %v1623_v63 = vmov 0  }
 0x2d7   :  { %1505 = vmatprep.subr.bf16.mxu0 %v3284_v44  ;;  %1528 = vmatpush3.bf16.msra.mxu1 %v857_v10  ;;  %v1452_v10 = vpop.f32.mrb[1].mxu1  ;;  %v1402_v61 = vld [vmem:[%s3221_s6 + $0x20] sm:$0xff]  ;;  %v1404_v14 = vld [vmem:[%s3221_s6 + $0x30] sm:$0xff] }
 0x2d8   :  { %1529 = vmatprep.subr.bf16.mxu1 %v866_v27  ;;  %v522_v41 = vadd.f32 %v521_v59, %v520_v4  ;;  %v676_v40 = vsub.s32 0, %v675_v25  ;;  %v1453_v33 = vadd.f32 %v1452_v10, %v1451_v49  ;;  %v1454_v32 = vpop.f32.mrb[2].mxu1 }
 0x2d9   :  { %v1455_v44 = vpop.f32.mrb[3].mxu1 }
 0x2da   :  { %1506 = vmatpush3.bf16.msra.mxu0 %v3287_v62  ;;  %621 = vst.msk [vmem:[%s3225_s10] sm:$0x1] %vm620_vm1, %v522_v41  ;;  %v677_v43 = vrot.slane %v522_v41, %v676_v40  ;;  %v875_v3 = vrot.slane %v134_v38, %v676_v40  ;;  %v1403_v40 = vld [vmem:[%s3221_s6 + $0x28] sm:$0xff] }
 0x2db   :  { %1507 = vmatprep.subr.bf16.mxu0 %v3290_v31  ;;  %1530 = vmatpush3.bf16.msra.mxu1 %v858_v51 }
 0x2dc   :  { %1531 = vmatprep.subr.bf16.mxu1 %v867_v15  ;;  %v735_v27 = vadd.f32 %v1431_v46, %v677_v43  ;;  %v1405_v43 = vld [vmem:[%s3221_s6 + $0x38] sm:$0xff]  ;;  %v1195_v46 = vpack.c.bf16 %v1404_v14, %v1402_v61 }
 0x2dd   :  { %v1196_v49 = vpack.c.bf16 %v1405_v43, %v1403_v40 }
 0x2de   :  { %1508 = vmatpush3.bf16.msra.mxu0 %v3293_v34  ;;  %v775_v51 = vadd.f32 %v1453_v33, %v735_v27 }
 0x2df   :  { %1509 = vmatprep.subr.bf16.mxu0 %v3296_v24  ;;  %1532 = vmatpush3.bf16.msra.mxu1 %v859_v42 }
 0x2e0   :  { %1533 = vmatprep.subr.bf16.mxu1 %v868_v26 }
 0x2e2   :  { %1510 = vmatpush3.bf16.msra.mxu0 %v3299_v50 }
 0x2e3   :  { %1511 = vmatprep.subr.bf16.mxu0 %v3302_v2  ;;  %1534 = vmatpush3.bf16.msra.mxu1 %v860_v47 }
 0x2e4   :  { %1535 = vmatprep.subr.bf16.mxu1 %v869_v53 }
 0x2e6   :  { %1512 = vmatpush3.bf16.msra.mxu0 %v3305_v17 }
 0x2e7   :  { %1513 = vmatprep.subr.bf16.mxu0 %v3308_v30  ;;  %1536 = vmatpush3.bf16.msra.mxu1 %v861_v28 }
 0x2e8   :  { %1537 = vmatprep.subr.bf16.mxu1 %v870_v1  ;;  %v1055_v1 = vld [vmem:[%s3221_s6 + $0x8] sm:$0xff] }
 0x2e9   :  { %v1059_v30 = vpack.c.bf16 %v1057_v20, %v1055_v1 }
 0x2ea   :  { %1514 = vmatpush3.bf16.msra.mxu0 %v3311_v48 }
 0x2eb   :  { %1515 = vmatprep.subr.bf16.mxu0 %v3314_v9  ;;  %1538 = vmatpush3.bf16.msra.mxu1 %v862_v45  ;;  %v1056_v45 = vld [vmem:[%s3221_s6 + $0x10] sm:$0xff] }
 0x2ec   :  { %v1058_v13 = vpack.c.bf16 %v1056_v45, %v1054_v35  ;;  %1203 = vmatprep.subr.bf16.mxu1 %v1196_v49 }
 0x2ee   :  { %1516 = vmatpush3.bf16.msra.mxu0 %v3317_v52  ;;  %1011 = vmatmul.mubr.bf16.vlgmr.msra.gmra.mrb[8].mxu1 %v1398_v21 }
 0x2ef   :  { %1235 = vmatprep.mubr.bf16.mxu1 %v1623_v63  ;;  %1063 = vmatprep.subr.bf16.mxu0 %v1059_v30 }
 0x2f0   :  { %1204 = vmatpush1.bf16.msra.mxu1 %v1195_v46 }
 0x2f1   :  { %971 = vmatmul.mubr.bf16.vlgmr.msra.gmra.mrb[8].mxu0 %v1396_v39 }
 0x2f2   :  { %1095 = vmatprep.mubr.bf16.mxu0 %v1623_v63  ;;  %1064 = vmatpush1.bf16.msra.mxu0 %v1058_v13 }
 0x3a0   :  { %v1495_v56 = vpop.f32.mrb[4].mxu1 }
 0x3a1   :  { %v1496_v15 = vpop.f32.mrb[5].mxu1 }
 0x3a2   :  { %v1497_v16 = vadd.f32 %v1496_v15, %v1495_v56  ;;  %v1498_v31 = vpop.f32.mrb[6].mxu1 }
 0x3a3   :  { %v1499_v11 = vpop.f32.mrb[7].mxu1 }
 0x3a4   :  { %v1473_v62 = vpop.f32.mrb[4].mxu0  ;;  %v933_v34 = vadd.f32 %v1497_v16, %v875_v3 }
 0x3a5   :  { %v1474_v23 = vpop.f32.mrb[5].mxu0 }
 0x3a6   :  { %v1475_v42 = vadd.f32 %v1474_v23, %v1473_v62  ;;  %v1476_v60 = vpop.f32.mrb[6].mxu0 }
 0x3a7   :  { %v1477_v26 = vpop.f32.mrb[7].mxu0 }
 0x3a8   :  { %v3117_v37 = vadd.f32 %v1475_v42, %v775_v51 }
 0x3aa   :  { %v1018_v7 = vmul.f32 %v3117_v37, %v3117_v37 }
 0x3ac   :  { %v1020_v9 = vsel %vm1019_vm2, %v1018_v7, 0.0 }
 0x3c1   :  { %v1539_v19 = vpop.f32.mrb[8].mxu1 }
 0x3c2   :  { %v1540_v47 = vpop.f32.mrb[9].mxu1 }
 0x3c3   :  { %v1541_v55 = vadd.f32 %v1540_v47, %v1539_v19  ;;  %v1542_v50 = vpop.f32.mrb[10].mxu1 }
 0x3c4   :  { %v1517_v24 = vpop.f32.mrb[8].mxu0  ;;  %v1543_v58 = vpop.f32.mrb[11].mxu1 }
 0x3c5   :  { %v1518_v18 = vpop.f32.mrb[9].mxu0 }
 0x3c6   :  { %v1519_v53 = vadd.f32 %v1518_v18, %v1517_v24  ;;  %v1520_v5 = vpop.f32.mrb[10].mxu0 }
 0x3c7   :  { %v1521_v2 = vpop.f32.mrb[11].mxu0 }
 0x3c8   :  { %v973_v28 = vadd.f32 %v1519_v53, %v933_v34 }
 0x3ca   :  { %v3119_v12 = vadd.f32 %v1541_v55, %v973_v28 }
 0x3cc   :  { %v1033_v8 = vmul.f32 %v3119_v12, %v3119_v12 }
 0x3ce   :  { %1158 = vrot.lane.b32.xlu0 %v1033_v8, %s1622_s3  ;;  %v1034_v17 = vsel %vm1019_vm2, %v1033_v8, 0.0 }
 0x3cf   :  { %1035 = vadd.xlane.f32.xlu1 %v1034_v17 }
 0x440   :  { %v1159_v48 = vpop.permute.xlu0 %1158 }
 0x441   :  { %v1161_v0 = vsel %vm1019_vm2, %v1159_v48, 0.0 }
 0x442   :  { %1162 = vadd.xlane.f32.xlu0 %v1161_v0 }
 0x446   :  { %1021 = vadd.xlane.f32.xlu0 %v1020_v9 }
 0x45c   :  { %v1036_v21 = vpop.xlane.xlu1 %1035 }
 0x45d   :  { %1572 = vrsqrt.f32 %v1036_v21  ;;  %vm1039_vm3 = vcmp.eq.f32.partialorder %v1036_v21, inf  ;;  %v1042_v57 = vand.u32 2147483648, %v1036_v21  ;;  %vm1041_vm4 = vcmp.eq.f32.partialorder %v1036_v21, 0.0 }
 0x467   :  { %v1573_v39 = vpop.eup %1572 }
 0x468   :  { %v1038_v29 = vmul.f32 %v1573_v39, %v1036_v21 }
 0x46a   :  { %v1040_v52 = vsel %vm1039_vm3, %v1036_v21, %v1038_v29 }
 0x46b   :  { %v1043_v22 = vsel %vm1041_vm4, %v1042_v57, %v1040_v52 }
 0x46c   :  { %v1044_v38 = vmax.f32 %v1043_v22, 1e-12 }
 0x46e   :  { %1574 = vrcp.f32 %v1044_v38 }
 0x478   :  { %v1575_v36 = vpop.eup %1574 }
 0x479   :  { %v3142_v4 = vmul.f32 %v1575_v36, %v3119_v12 }
 0x47b   :  { %v1053_v59 = vpack.c.bf16 %v3142_v4, %v3142_v4 }
 0x47d   :  { %1400 = vmatmul.mubr.msk.bf16.vlgmr.msra.gmra.mrb[12].mxu0 %vm1019_vm2, %v1053_v59 }
 0x4cf   :  { %v1163_v25 = vpop.xlane.xlu0 %1162 }
 0x4d0   :  { %1576 = vrsqrt.f32 %v1163_v25  ;;  %vm1166_vm5 = vcmp.eq.f32.partialorder %v1163_v25, inf  ;;  %v1169_v54 = vand.u32 2147483648, %v1163_v25  ;;  %vm1168_vm6 = vcmp.eq.f32.partialorder %v1163_v25, 0.0 }
 0x4d3   :  { %v1022_v41 = vpop.xlane.xlu0 %1021 }
 0x4d4   :  { %1578 = vrsqrt.f32 %v1022_v41  ;;  %vm1025_vm7 = vcmp.eq.f32.partialorder %v1022_v41, inf  ;;  %v1028_v56 = vand.u32 2147483648, %v1022_v41  ;;  %vm1027_vm8 = vcmp.eq.f32.partialorder %v1022_v41, 0.0 }
 0x4da   :  { %v1577_v6 = vpop.eup %1576 }
 0x4db   :  { %v1165_v10 = vmul.f32 %v1577_v6, %v1163_v25 }
 0x4dd   :  { %v1167_v27 = vsel %vm1166_vm5, %v1163_v25, %v1165_v10 }
 0x4de   :  { %v1579_v33 = vpop.eup %1578  ;;  %v1170_v32 = vsel %vm1168_vm6, %v1169_v54, %v1167_v27 }
 0x4df   :  { %v1171_v44 = vmax.f32 %v1170_v32, 1e-12  ;;  %v1024_v51 = vmul.f32 %v1579_v33, %v1022_v41 }
 0x4e1   :  { %1580 = vrcp.f32 %v1171_v44  ;;  %v1026_v3 = vsel %vm1025_vm7, %v1022_v41, %v1024_v51  ;;  %v1624_v44 = vmov 0.0  }
 0x4e2   :  { %v1029_v62 = vsel %vm1027_vm8, %v1028_v56, %v1026_v3 }
 0x4e3   :  { %v1030_v15 = vmax.f32 %v1029_v62, 1e-12 }
 0x4e5   :  { %1582 = vrcp.f32 %v1030_v15 }
 0x4eb   :  { %v1581_v23 = vpop.eup %1580 }
 0x4ec   :  { %v1173_v16 = vmul.f32 %v1581_v23, %v3119_v12 }
 0x4ee   :  { %v1189_v31 = vpack.c.bf16 %v1173_v16, %v1173_v16 }
 0x4ef   :  { %v1583_v42 = vpop.eup %1582 }
 0x4f0   :  { %1198 = vrot.lane.b32.xlu1 %v1189_v31, %s1622_s3  ;;  %v1032_v60 = vmul.f32 %v1583_v42, %v3117_v37 }
 0x4f2   :  { %1047 = vst.msk [vmem:[%s3226_s11] sm:$0xff] %vm1019_vm2, %v1032_v60  ;;  %v1048_v30 = vmul.f32 %v3142_v4, %v1032_v60 }
 0x4f4   :  { %1141 = vrot.lane.b32.xlu1 %v1018_v7, %s1622_s3  ;;  %v1049_v45 = vsel %vm1019_vm2, %v1048_v30, 0.0 }
 0x550   :  { %v1097_v11 = vpop.f32.mrb[12].mxu0 }
 0x551   :  { %v1099_v34 = vpop.f32.mrb[13].mxu0  ;;  %v1104_v47 = vmul.f32 14.285714, %v1097_v11 }
 0x552   :  { %v1101_v26 = vpop.f32.mrb[14].mxu0  ;;  %v1105_v18 = vmul.f32 14.285714, %v1099_v34 }
 0x553   :  { %v1102_v19 = vpop.f32.mrb[15].mxu0 }
 0x554   :  { %v1106_v53 = vmax.f32 %v1104_v47, %v1105_v18  ;;  %v1318_v19 = vld [vmem:[%s3223_s8] sm:$0xff] }
 0x562   :  { %v1199_v24 = vpop.permute.xlu1 %1198 }
 0x563   :  { %1406 = vmatmul.mubr.msk.bf16.vlgmr.msra.gmra.mrb[12].mxu1 %vm1019_vm2, %v1199_v24  ;;  %v1319_v24 = vld [vmem:[%s3223_s8 + $0x8] sm:$0xff] }
 0x566   :  { %v1142_v55 = vpop.permute.xlu1 %1141 }
 0x567   :  { %v1144_v50 = vsel %vm1019_vm2, %v1142_v55, 0.0 }
 0x568   :  { %1145 = vadd.xlane.f32.xlu1 %v1144_v50 }
 0x56c   :  { %1107 = vmax.xlane.f32.xlu1 %v1106_v53  ;;  %v1316_v53 = vld [vmem:[%s3222_s7] sm:$0xff] }
 0x5f5   :  { %v1146_v5 = vpop.xlane.xlu1 %1145 }
 0x5f6   :  { %1584 = vrsqrt.f32 %v1146_v5  ;;  %vm1149_vm9 = vcmp.eq.f32.partialorder %v1146_v5, inf  ;;  %v1152_v28 = vand.u32 2147483648, %v1146_v5  ;;  %vm1151_vm10 = vcmp.eq.f32.partialorder %v1146_v5, 0.0 }
 0x5f9   :  { %v1108_v52 = vpop.xlane.xlu1 %1107 }
 0x600   :  { %v1585_v58 = vpop.eup %1584 }
 0x601   :  { %v1148_v2 = vmul.f32 %v1585_v58, %v1146_v5 }
 0x603   :  { %v1150_v12 = vsel %vm1149_vm9, %v1146_v5, %v1148_v2  ;;  %v1317_v5 = vld [vmem:[%s3222_s7 + $0x8] sm:$0xff]  ;;  %v1320_v2 = vmul.f32 %v1316_v53, %v1316_v53  ;;  %s1625_s7 = smov 0.0  }
 0x604   :  { %v1153_v8 = vsel %vm1151_vm10, %v1152_v28, %v1150_v12  ;;  %v1321_v28 = vmul.f32 %v1317_v5, %v1317_v5  ;;  %1356 = sst [smem:[#allocation2 + $0x5]] %s1625_s7 }
 0x605   :  { %v1154_v17 = vmax.f32 %v1153_v8, 1e-12  ;;  %1358 = sst [smem:[#allocation2 + $0x6]] %s1625_s7 }
 0x606   :  { %1360 = sst [smem:[#allocation2 + $0x7]] %s1625_s7 }
 0x607   :  { %1586 = vrcp.f32 %v1154_v17 }
 0x611   :  { %v1587_v1 = vpop.eup %1586 }
 0x612   :  { %v3170_v20 = vmul.f32 %v1587_v1, %v3117_v37 }
 0x614   :  { %v1180_v35 = vmul.f32 %v1173_v16, %v3170_v20 }
 0x616   :  { %1182 = vrot.lane.b32.xlu0 %v1180_v35, %s1622_s3 }
 0x635   :  { %1050 = vadd.xlane.f32.xlu0 %v1049_v45 }
 0x636   :  { %v1237_v63 = vpop.f32.mrb[12].mxu1 }
 0x637   :  { %v1239_v13 = vpop.f32.mrb[13].mxu1  ;;  %v1244_v7 = vmul.f32 14.285714, %v1237_v63 }
 0x638   :  { %v1241_v48 = vpop.f32.mrb[14].mxu1  ;;  %v1245_v9 = vmul.f32 14.285714, %v1239_v13 }
 0x639   :  { %v1242_v0 = vpop.f32.mrb[15].mxu1 }
 0x63a   :  { %v1246_v37 = vmax.f32 %v1244_v7, %v1245_v9 }
 0x688   :  { %v1183_v21 = vpop.permute.xlu0 %1182 }
 0x689   :  { %v1185_v39 = vsel %vm1019_vm2, %v1183_v21, 0.0 }
 0x68a   :  { %1186 = vadd.xlane.f32.xlu1 %v1185_v39 }
 0x68e   :  { %1247 = vmax.xlane.f32.xlu1 %v1246_v37 }
 0x6c2   :  { %v1051_v29 = vpop.xlane.xlu0 %1050 }
 0x6c3   :  { %v1052_v57 = vmul.f32 14.285714, %v1051_v29 }
 0x6c5   :  { %v1109_v22 = vmax.f32 %v1052_v57, %v1108_v52 }
 0x6c7   :  { %v1113_v38 = vsub.f32 %v1104_v47, %v1109_v22  ;;  %v1114_v36 = vsub.f32 %v1105_v18, %v1109_v22  ;;  %v1110_v62 = vsub.f32 %v1052_v57, %v1109_v22  ;;  %v1322_v47 = vmul.f32 1.442695, %v1318_v19 }
 0x6c8   :  { %v1324_v18 = vmul.f32 1.442695, %v1319_v24 }
 0x6c9   :  { %v1115_v4 = vmul.f32 1.442695, %v1113_v38  ;;  %v1117_v59 = vmul.f32 1.442695, %v1114_v36  ;;  %v1111_v15 = vmul.f32 1.442695, %v1110_v62 }
 0x6cb   :  { %1588 = vpow2.f32 %v1115_v4 }
 0x6cc   :  { %1590 = vpow2.f32 %v1117_v59 }
 0x6d5   :  { %v1589_v25 = vpop.eup %1588 }
 0x6d6   :  { %v1591_v41 = vpop.eup %1590 }
 0x6d7   :  { %v1119_v40 = vadd.f32 %v1591_v41, %v1589_v25 }
 0x6d9   :  { %1120 = vadd.xlane.f32.xlu1 %v1119_v40 }
 0x717   :  { %v1187_v43 = vpop.xlane.xlu1 %1186 }
 0x718   :  { %v3177_v61 = vmul.f32 14.285714, %v1187_v43 }
 0x71a   :  { %vm1279_vm11 = vcmp.gt.f32.partialorder %v1244_v7, %v3177_v61  ;;  %vm1280_vm12 = vcmp.gt.f32.partialorder %v1245_v9, %v3177_v61 }
 0x71b   :  { %v1248_v14 = vpop.xlane.xlu1 %1247  ;;  %v1407_v51 = vsel %vm1279_vm11, 1.0, %v1624_v44  ;;  %v1408_v56 = vsel %vm1280_vm12, 1.0, %v1624_v44 }
 0x71c   :  { %v3180_v49 = vmax.f32 %v3177_v61, %v1248_v14  ;;  %v1285_v3 = vadd.f32 %v1408_v56, %v1407_v51 }
 0x71e   :  { %v1253_v46 = vsub.f32 %v1244_v7, %v3180_v49  ;;  %v1254_v6 = vsub.f32 %v1245_v9, %v3180_v49  ;;  %v1250_v55 = vsub.f32 %v3177_v61, %v3180_v49 }
 0x720   :  { %v1255_v10 = vmul.f32 1.442695, %v1253_v46  ;;  %v1257_v54 = vmul.f32 1.442695, %v1254_v6  ;;  %v1251_v50 = vmul.f32 1.442695, %v1250_v55 }
 0x722   :  { %1592 = vpow2.f32 %v1255_v10 }
 0x723   :  { %1594 = vpow2.f32 %v1257_v54 }
 0x724   :  { %1596 = vpow2.f32 %v1111_v15 }
 0x72c   :  { %v1593_v27 = vpop.eup %1592 }
 0x72d   :  { %v1595_v33 = vpop.eup %1594 }
 0x72e   :  { %v1259_v32 = vadd.f32 %v1595_v33, %v1593_v27  ;;  %v1597_v23 = vpop.eup %1596 }
 0x730   :  { %1260 = vadd.xlane.f32.xlu1 %v1259_v32 }
 0x734   :  { %1286 = vadd.xlane.f32.xlu1 %v1285_v3 }
 0x766   :  { %v1121_v16 = vpop.xlane.xlu1 %1120 }
 0x767   :  { %v1122_v31 = vadd.f32 %v1597_v23, %v1121_v16 }
 0x769   :  { %1598 = vlog2.f32 %v1122_v31 }
 0x76a   :  { %1600 = vpow2.f32 %v1322_v47 }
 0x76b   :  { %1602 = vpow2.f32 %v1324_v18 }
 0x76c   :  { %1604 = vpow2.f32 %v1251_v50 }
 0x773   :  { %v1599_v42 = vpop.eup %1598 }
 0x774   :  { %v1124_v60 = vmul.f32 0.6931472, %v1599_v42  ;;  %v1601_v58 = vpop.eup %1600 }
 0x775   :  { %v1603_v12 = vpop.eup %1602  ;;  %v1326_v8 = vadd.f32 %v1601_v58, %v1320_v2 }
 0x776   :  { %v1125_v11 = vadd.f32 %v1124_v60, %v1109_v22  ;;  %v1327_v17 = vadd.f32 %v1603_v12, %v1321_v28  ;;  %v1605_v1 = vpop.eup %1604 }
 0x777   :  { %v1411_v30 = vadd.f32 -1.0, %v1326_v8 }
 0x778   :  { %v1126_v34 = vsub.f32 %v1125_v11, %v1052_v57  ;;  %v1412_v45 = vadd.f32 -1.0, %v1327_v17 }
 0x779   :  { %v1330_v48 = vsub.f32 %v1411_v30, %v1318_v19 }
 0x77a   :  { %v1128_v26 = vsel %vm1127_vm13, %v1126_v34, 0.0  ;;  %v1331_v0 = vsub.f32 %v1412_v45, %v1319_v24 }
 0x77b   :  { %1129 = vadd.xlane.f32.xlu1 %v1128_v26 }
 0x77c   :  { %v1332_v21 = vadd.f32 %v1331_v0, %v1330_v48 }
 0x7bd   :  { %v1261_v35 = vpop.xlane.xlu1 %1260 }
 0x7be   :  { %v1262_v63 = vadd.f32 %v1605_v1, %v1261_v35 }
 0x7c0   :  { %1606 = vlog2.f32 %v1262_v63 }
 0x7c1   :  { %v1287_v13 = vpop.xlane.xlu1 %1286 }
 0x7c2   :  { %vm1288_vm14 = vcmp.lt.f32.partialorder %v1287_v13, 1.0  ;;  %vm1302_vm15 = vcmp.lt.f32.partialorder %v1287_v13, 5.0 }
 0x7c3   :  { %v1409_v7 = vsel %vm1288_vm14, 1.0, %v1624_v44  ;;  %v1410_v22 = vsel %vm1302_vm15, 1.0, %v1624_v44 }
 0x7c4   :  { %v1291_v9 = vsel %vm1127_vm13, %v1409_v7, 0.0  ;;  %v1305_v38 = vsel %vm1127_vm13, %v1410_v22, 0.0 }
 0x7c5   :  { %1292 = vadd.xlane.f32.xlu0 %v1291_v9 }
 0x7c9   :  { %1333 = vadd.xlane.f32.xlu0 %v1332_v21 }
 0x7ca   :  { %v1607_v39 = vpop.eup %1606 }
 0x7cb   :  { %v1264_v37 = vmul.f32 0.6931472, %v1607_v39 }
 0x7cd   :  { %v1265_v29 = vadd.f32 %v1264_v37, %v3180_v49 }
 0x7cf   :  { %v1266_v57 = vsub.f32 %v1265_v29, %v3177_v61 }
 0x7d1   :  { %v1267_v52 = vsel %vm1127_vm13, %v1266_v57, 0.0 }
 0x7d2   :  { %1268 = vadd.xlane.f32.xlu1 %v1267_v52 }
 0x7d6   :  { %1306 = vadd.xlane.f32.xlu1 %v1305_v38 }
 0x7e7   :  { %1175 = vrot.lane.b32.xlu1 %v3170_v20, %s1622_s3 }
 0x808   :  { %v1130_v36 = vpop.xlane.xlu1 %1129 }
 0x809   :  { %v1131_v4 = vrot.slane %v1130_v36, 4 }
 0x80b   :  { %v1132_v59 = vadd.f32 %v1131_v4, %v1130_v36 }
 0x80d   :  { %v1133_v25 = vrot.slane %v1132_v59, 2 }
 0x80f   :  { %v1134_v41 = vadd.f32 %v1133_v25, %v1132_v59 }
 0x811   :  { %v1135_v40 = vrot.slane %v1134_v41, 1 }
 0x813   :  { %v1136_v43 = vadd.f32 %v1135_v40, %v1134_v41 }
 0x815   :  { %1545 = vpush %v1136_v43 }
 0x846   :  { %s1546_s5 = spop %1545 }
 0x847   :  { %s1138_s10 = smul.f32 0.0625, %s1546_s5 }
 0x852   :  { %v1293_v61 = vpop.xlane.xlu0 %1292 }
 0x853   :  { %v1294_v14 = vrot.slane %v1293_v61, 4 }
 0x855   :  { %v1295_v46 = vadd.f32 %v1294_v14, %v1293_v61 }
 0x856   :  { %v1334_v49 = vpop.xlane.xlu0 %1333 }
 0x857   :  { %v1335_v6 = vrot.slane %v1334_v49, 4  ;;  %v1296_v10 = vrot.slane %v1295_v46, 2 }
 0x859   :  { %v1336_v54 = vadd.f32 %v1335_v6, %v1334_v49  ;;  %v1297_v51 = vadd.f32 %v1296_v10, %v1295_v46 }
 0x85b   :  { %v1337_v32 = vrot.slane %v1336_v54, 2  ;;  %v1298_v31 = vrot.slane %v1297_v51, 1 }
 0x85d   :  { %v1338_v23 = vadd.f32 %v1337_v32, %v1336_v54  ;;  %v1299_v26 = vadd.f32 %v1298_v31, %v1297_v51 }
 0x85f   :  { %v1269_v20 = vpop.xlane.xlu1 %1268  ;;  %v1339_v19 = vrot.slane %v1338_v23, 1 }
 0x860   :  { %v1270_v27 = vrot.slane %v1269_v20, 4 }
 0x861   :  { %v1340_v18 = vadd.f32 %v1339_v19, %v1338_v23 }
 0x862   :  { %v1271_v33 = vadd.f32 %v1270_v27, %v1269_v20 }
 0x863   :  { %v1307_v44 = vpop.xlane.xlu1 %1306 }
 0x864   :  { %v1272_v56 = vrot.slane %v1271_v33, 2  ;;  %v1308_v3 = vrot.slane %v1307_v44, 4 }
 0x866   :  { %v1309_v62 = vadd.f32 %v1308_v3, %v1307_v44  ;;  %v1273_v15 = vadd.f32 %v1272_v56, %v1271_v33 }
 0x867   :  { %v1176_v16 = vpop.permute.xlu1 %1175 }
 0x868   :  { %v1310_v42 = vrot.slane %v1309_v62, 2  ;;  %1401 = vst.msk [vmem:[%s3226_s11 + $0x8] sm:$0xff] %vm1019_vm2, %v1176_v16  ;;  %v1274_v60 = vrot.slane %v1273_v15, 1 }
 0x86a   :  { %v1275_v11 = vadd.f32 %v1274_v60, %v1273_v15  ;;  %v1311_v34 = vadd.f32 %v1310_v42, %v1309_v62 }
 0x86c   :  { %1547 = vpush %v1275_v11  ;;  %v1312_v24 = vrot.slane %v1311_v34, 1 }
 0x86d   :  { %1549 = vpush %v1299_v26 }
 0x86e   :  { %v1313_v47 = vadd.f32 %v1312_v24, %v1311_v34 }
 0x870   :  { %1551 = vpush %v1313_v47 }
 0x871   :  { %1553 = vpush %v1340_v18 }
 0x89d   :  { %s1548_s2 = spop %1547 }
 0x89e   :  { %s1277_s16 = smul.f32 0.0625, %s1548_s2  ;;  %s1550_s17 = spop %1549 }
 0x89f   :  { %s1301_s18 = smul.f32 12.5, %s1550_s17 }
 0x8a0   :  { %s1278_s4 = sadd.f32 %s1277_s16, %s1138_s10 }
 0x8a1   :  { %1348 = sst [smem:[#allocation2 + $0x1]] %s1301_s18  ;;  %s1552_s11 = spop %1551 }
 0x8a2   :  { %1354 = sst [smem:[#allocation2 + $0x4]] %s1278_s4  ;;  %s1315_s19 = smul.f32 12.5, %s1552_s11 }
 0x8a3   :  { %s1554_s20 = spop %1553 }
 0x8a4   :  { %1350 = sst [smem:[#allocation2 + $0x2]] %s1315_s19  ;;  %s1342_s23 = smul.f32 0.5, %s1554_s20 }
 0x8a6   :  { %s1343_s24 = smul.f32 0.125, %s1342_s23 }
 0x8a8   :  { %s1344_s25 = sadd.f32 %s1343_s24, %s1278_s4 }
 0x8a9   :  { %1352 = sst [smem:[#allocation2 + $0x3]] %s1343_s24 }
 0x8aa   :  { %1346 = sst [smem:[#allocation2]] %s1344_s25 }
 0x8ab   :  { %1619 = shalt.err (!%p1616_p4)
}
 0x8ac   :  { %s1626_s6 = smov [#allocation2]  }
 0x8ad   :  { %1376 = dma.smem_to_vmem %s1626_s6, 16, %s1374_s22, [#allocation3]  }
 0x8ae   :  { %1620 = dma.done.wait [#allocation3], 16  }
 0x8af   :  { %1621 = vsyncadd [#allocation3], 4294967280 }
 0x8b0   :  { %1386 = sfence }
 0x8b1   :  { %1387 = vsyncpa [#allocation3], 1 }

</bundles_post_ra>
